<compile_context>
chip_gen: v6e
topology: v6e:2x2x1
jax: 0.10.0
libtpu: 0.0.40
codegen_flags: <defaults>
</compile_context>

<pallas_src>
import functools
import math

import jax
import jax.numpy as jnp
from jax.experimental import pallas as pl
from jax.experimental.pallas import tpu as pltpu


def _round_up(x, m):
    return (x + m - 1) // m * m


# --------------------------------------------------------------------------
# Pallas kernel 1: fused matmul + bias + optional ReLU  (conv-as-matmul)
#   A tile (TM, K) bf16, W (K, Cp) bf16, bias (1, Cp) f32 -> out (TM, Cp) f32
# --------------------------------------------------------------------------
def _mba_kernel(a_ref, w_ref, b_ref, o_ref, *, apply_relu):
    acc = jnp.dot(a_ref[...], w_ref[...], preferred_element_type=jnp.float32)
    acc = acc + b_ref[...]
    if apply_relu:
        acc = jnp.maximum(acc, 0.0)
    o_ref[...] = acc.astype(o_ref.dtype)


def matmul_bias_act(a, w, b, *, relu, tm=256):
    """a: (M, K) bf16, w: (K, Cp) bf16, b: (1, Cp) f32 -> (M, Cp) f32.

    K and Cp must be multiples of 128 (caller pads). M is padded/tiled here.
    """
    M, K = a.shape
    Kw, Cp = w.shape
    assert K == Kw and K % 128 == 0 and Cp % 128 == 0

    if M >= tm:
        TM = tm
    else:
        TM = _round_up(max(M, 8), 16)          # bf16 sublane tile = 16
    Mp = _round_up(M, TM)
    if Mp != M:
        a = jnp.pad(a, ((0, Mp - M), (0, 0)))

    kernel = functools.partial(_mba_kernel, apply_relu=relu)
    out = pl.pallas_call(
        kernel,
        out_shape=jax.ShapeDtypeStruct((Mp, Cp), jnp.float32),
        grid_spec=pltpu.PrefetchScalarGridSpec(
            num_scalar_prefetch=0,
            grid=(Mp // TM,),
            in_specs=[
                pl.BlockSpec((TM, K), lambda i: (i, 0)),
                pl.BlockSpec((K, Cp), lambda i: (0, 0)),   # weights stay resident
                pl.BlockSpec((1, Cp), lambda i: (0, 0)),
            ],
            out_specs=pl.BlockSpec((TM, Cp), lambda i: (i, 0)),
        ),
        compiler_params=pltpu.CompilerParams(
            dimension_semantics=("parallel",),             # megacore shards row tiles
        ),
    )(a, w, b)
    return out[:M]


# --------------------------------------------------------------------------
# Pallas kernel 2: fused attention
#   q = PE @ Wq + bq ; s = softmax(q K^T / sqrt(E)) ; vec = s V
# --------------------------------------------------------------------------
def _attn_kernel(pe_ref, wq_ref, bq_ref, k_ref, v_ref, vec_ref, sc_ref, *, inv_sqrt_e):
    q = jnp.dot(pe_ref[...], wq_ref[...], preferred_element_type=jnp.float32)
    q = q + bq_ref[...]                                     # (T, E)
    k = k_ref[0]                                            # (S, E)
    v = v_ref[0]                                            # (S, E)

    s = jnp.einsum("te,se->ts", q, k,
                   preferred_element_type=jnp.float32) * inv_sqrt_e
    s = s - jnp.max(s, axis=-1, keepdims=True)
    p = jnp.exp(s)
    p = p * pl.reciprocal(jnp.sum(p, axis=-1, keepdims=True), approx=True)

    vec_ref[0] = jnp.dot(p, v, preferred_element_type=jnp.float32).astype(vec_ref.dtype)
    sc_ref[0] = p.astype(sc_ref.dtype)


def attention_pallas(pe, w_q, b_q, key, v):
    """pe: (T,E), w_q: (E,E), b_q: (1,E), key: (N,S,E), v: (N,S,E)
    -> attn_vecs (N,T,E) f32, attn_scores (N,T,S) f32."""
    N, S, E = key.shape
    T = pe.shape[0]
    kernel = functools.partial(_attn_kernel, inv_sqrt_e=1.0 / math.sqrt(E))
    return pl.pallas_call(
        kernel,
        out_shape=(
            jax.ShapeDtypeStruct((N, T, E), jnp.float32),
            jax.ShapeDtypeStruct((N, T, S), jnp.float32),
        ),
        grid_spec=pltpu.PrefetchScalarGridSpec(
            num_scalar_prefetch=0,
            grid=(N,),
            in_specs=[
                pl.BlockSpec((T, E), lambda b: (0, 0)),     # PE (batch invariant)
                pl.BlockSpec((E, E), lambda b: (0, 0)),     # Wproj^T
                pl.BlockSpec((1, E), lambda b: (0, 0)),     # proj bias
                pl.BlockSpec((1, S, E), lambda b: (b, 0, 0)),
                pl.BlockSpec((1, S, E), lambda b: (b, 0, 0)),
            ],
            out_specs=(
                pl.BlockSpec((1, T, E), lambda b: (b, 0, 0)),
                pl.BlockSpec((1, T, S), lambda b: (b, 0, 0)),
            ),
        ),
        compiler_params=pltpu.CompilerParams(
            dimension_semantics=("parallel",),
        ),
    )(pe, w_q, b_q, key, v)


# --------------------------------------------------------------------------
# Glue: NHWC im2col, nearest upsample (broadcast), BN folding (layout plumbing)
# --------------------------------------------------------------------------
def _im2col_nhwc(x, k, stride, pad):
    N, H, W, C = x.shape
    sh, sw = stride
    Ho = (H + 2 * pad - k) // sh + 1
    Wo = (W + 2 * pad - k) // sw + 1
    xp = jnp.pad(x, ((0, 0), (pad, pad), (pad, pad), (0, 0)))
    cols = []
    for di in range(k):
        for dj in range(k):
            cols.append(
                xp[:, di:di + sh * (Ho - 1) + 1:sh, dj:dj + sw * (Wo - 1) + 1:sw, :]
            )
    patches = jnp.concatenate(cols, axis=-1)        # (N, Ho, Wo, k*k*C), (kh,kw,C) order
    return patches.reshape(N * Ho * Wo, k * k * C), (N, Ho, Wo)


def conv_bn_act_nhwc(x_nhwc, layer, stride, relu=True):
    """Conv2d(k=3, p=1) + folded BatchNorm + ReLU via the Pallas matmul kernel. NHWC."""
    patches, (N, Ho, Wo) = _im2col_nhwc(x_nhwc, 3, stride, 1)
    M, k_real = patches.shape
    kp = layer["w"].shape[0]
    assert k_real == layer["k"]
    if kp != k_real:
        patches = jnp.pad(patches, ((0, 0), (0, kp - k_real)))
    patches = patches.astype(jnp.bfloat16)          # MXU operands in bf16, acc in f32
    out = matmul_bias_act(patches, layer["w"], layer["b"], relu=relu)
    out = out[:, : layer["cout"]]                   # drop lane padding
    return out.reshape(N, Ho, Wo, layer["cout"])


def resize_nearest_nhwc(x, h, w):
    """PyTorch legacy 'nearest': src = floor(dst * in / out). Broadcast for int ratios."""
    N, H, W, C = x.shape
    if (h, w) == (H, W):
        return x
    if h % H == 0 and w % W == 0:
        rh, rw = h // H, w // W
        y = jnp.broadcast_to(x[:, :, None, :, None, :], (N, H, rh, W, rw, C))
        return y.reshape(N, h, w, C)
    ih = (jnp.arange(h) * H) // h
    iw = (jnp.arange(w) * W) // w
    return x[:, ih][:, :, iw]


def fold_conv_bn(w, b, gamma, beta, mean, var, eps=1e-5):
    """Fold BatchNorm2d (eval) into conv; pad to lane-dense (Kp, 128k) and cast to bf16."""
    cout, cin, kh, kw = w.shape
    scale = gamma / jnp.sqrt(var + eps)
    w_f = w * scale[:, None, None, None]                         # (cout, cin, kh, kw)
    b_f = (b - mean) * scale + beta
    w_t = jnp.transpose(w_f, (2, 3, 1, 0)).reshape(kh * kw * cin, cout)  # (kh*kw*cin, cout)
    k_real = kh * kw * cin
    kp = _round_up(k_real, 128)
    cp = _round_up(cout, 128)
    w_pad = jnp.zeros((kp, cp), jnp.float32).at[:k_real, :cout].set(w_t).astype(jnp.bfloat16)
    b_pad = jnp.zeros((1, cp), jnp.float32).at[:, :cout].set(b_f.reshape(1, -1))
    return {"w": w_pad, "b": b_pad, "cout": int(cout), "k": int(k_real)}


# --------------------------------------------------------------------------
# Mini_UNet forward (NHWC end-to-end; each conv layer is one Pallas call)
# --------------------------------------------------------------------------
ENC_STRIDES = [(1, 2), (2, 2), (2, 2), (2, 2)]


def mini_unet_nhwc(x_nhwc, p):
    features = []
    k = x_nhwc
    for i in range(4):
        k = conv_bn_act_nhwc(k, p["enc"][i], ENC_STRIDES[i])
        features.append(k)
    for i in range(3):
        N, H, W, _ = k.shape
        k = resize_nearest_nhwc(k, 2 * H, 2 * W)
        k = conv_bn_act_nhwc(k, p["dec"][i], (1, 1))
        k = k + features[2 - i]
    k = resize_nearest_nhwc(k, p["h"], p["w"])
    key = conv_bn_act_nhwc(k, p["dec"][3], (1, 1))
    return key + x_nhwc


# --------------------------------------------------------------------------
# Positional encoding (sinusoidal); dropout is eval-mode identity
# --------------------------------------------------------------------------
def sinusoidal_pe(max_length, embedding_dim):
    position = jnp.arange(max_length, dtype=jnp.float32)[:, None]
    div_term = jnp.exp(
        jnp.arange(0, embedding_dim, 2, dtype=jnp.float32)
        * (-math.log(10000.0) / embedding_dim)
    )
    pe = jnp.zeros((max_length, embedding_dim), jnp.float32)
    pe = pe.at[:, 0::2].set(jnp.sin(position * div_term))
    pe = pe.at[:, 1::2].set(jnp.cos(position * div_term))
    return pe
    # TODO(synk): PositionEncoding's nn.Dropout(0.1) is omitted (eval-mode identity).


# --------------------------------------------------------------------------
# AttentionalDecoder forward
# --------------------------------------------------------------------------
def attentional_decoder_forward(x, params):
    N, E, H, W = x.shape
    x_nhwc = jnp.transpose(x, (0, 2, 3, 1))                  # single layout change
    key_nhwc = mini_unet_nhwc(x_nhwc, params["unet"])        # (N, H, W, E)

    key_flat = key_nhwc.reshape(N, H * W, E)                 # (N, S, E), no transpose
    v_flat = x_nhwc.reshape(N, H * W, E)                     # (N, S, E), no transpose

    # q = project(pos_encoder(zeros)) is fused into the attention kernel
    attn_vecs, attn_scores = attention_pallas(
        params["pos_pe"], params["proj_w_t"], params["proj_b"], key_flat, v_flat
    )
    T = params["pos_pe"].shape[0]
    attn_scores = attn_scores.reshape(N, T, H, W)
    return attn_vecs, attn_scores


# --------------------------------------------------------------------------
# Deterministic parameter init
# --------------------------------------------------------------------------
def init_params(key, in_c, uc, max_length, h, w):
    keys = jax.random.split(key, 64)
    ki = iter(keys)

    def conv_bn(cin, cout):
        wk = jax.random.normal(next(ki), (cout, cin, 3, 3), jnp.float32)
        wk = wk * (1.0 / math.sqrt(9 * cin))
        bk = 0.05 * jax.random.normal(next(ki), (cout,), jnp.float32)
        gamma = 1.0 + 0.1 * jax.random.normal(next(ki), (cout,), jnp.float32)
        beta = 0.1 * jax.random.normal(next(ki), (cout,), jnp.float32)
        mean = 0.1 * jax.random.normal(next(ki), (cout,), jnp.float32)
        var = jnp.abs(jax.random.normal(next(ki), (cout,), jnp.float32)) + 0.5
        return fold_conv_bn(wk, bk, gamma, beta, mean, var)

    enc_cfg = [(in_c, uc), (uc, uc), (uc, uc), (uc, uc)]
    dec_cfg = [(uc, uc), (uc, uc), (uc, uc), (uc, in_c)]
    enc = [conv_bn(ci, co) for ci, co in enc_cfg]
    dec = [conv_bn(ci, co) for ci, co in dec_cfg]

    proj_w = jax.random.normal(next(ki), (in_c, in_c), jnp.float32) * (1.0 / math.sqrt(in_c))
    proj_b = 0.05 * jax.random.normal(next(ki), (in_c,), jnp.float32)

    return {
        "unet": {"enc": enc, "dec": dec, "h": h, "w": w},
        "proj_w_t": proj_w.T,                  # Linear: y = x @ W^T + b
        "proj_b": proj_b.reshape(1, -1),
        "pos_pe": sinusoidal_pe(max_length, in_c),
    }


if __name__ == "__main__":
    # Small config: img_h=32, img_w=64 -> decoder input H=8, W=16; E=32; T=8.
    N, E, H, W = 2, 32, 8, 16
    UNET_C = 8
    MAX_LEN = 8

    root = jax.random.PRNGKey(0)
    k_x, k_p = jax.random.split(root)
    x = jax.random.normal(k_x, (N, E, H, W), jnp.float32)
    params = init_params(k_p, in_c=E, uc=UNET_C, max_length=MAX_LEN, h=H, w=W)

    forward = jax.jit(lambda inp: attentional_decoder_forward(inp, params))
    attn_vecs, attn_scores = forward(x)
    attn_vecs = jax.block_until_ready(attn_vecs)
    attn_scores = jax.block_until_ready(attn_scores)

    assert attn_vecs.shape == (N, MAX_LEN, E)
    assert attn_scores.shape == (N, MAX_LEN, H, W)
    assert bool(jnp.all(jnp.isfinite(attn_vecs)))
    assert bool(jnp.all(jnp.isfinite(attn_scores)))
    # softmax rows must sum to ~1 (approx EUP reciprocal -> slightly looser tol)
    row_sums = attn_scores.reshape(N, MAX_LEN, -1).sum(-1)
    assert bool(jnp.allclose(row_sums, 1.0, atol=5e-3))

    print("KERNEL_OK")
</pallas_src>

<mosaic_0001>
module attributes {stable_mosaic.version = 11 : i64} {
  func.func @_mba_kernel(%arg0: i32, %arg1: memref<128x384xbf16, #tpu.memory_space<vmem>>, %arg2: memref<384x128xbf16, #tpu.memory_space<vmem>>, %arg3: memref<1x128xf32, #tpu.memory_space<vmem>>, %arg4: memref<128x128xf32, #tpu.memory_space<vmem>>) attributes {dimension_semantics = [#tpu.dimension_semantics<parallel>], iteration_bounds = array<i64: 1>, scalar_prefetch = 0 : i64, scratch_operands = 0 : i64, tpu.core_type = #tpu.core_type<tc>, window_params = [{transform_indices = @transform_0, window_bounds = array<i64: 128, 384>}, {pipeline_mode = #tpu.pipeline_mode<synchronous>, transform_indices = @transform_1, window_bounds = array<i64: 384, 128>}, {pipeline_mode = #tpu.pipeline_mode<synchronous>, transform_indices = @transform_2, window_bounds = array<i64: 1, 128>}, {transform_indices = @transform_3, window_bounds = array<i64: 128, 128>}]} {
    %c0 = arith.constant 0 : index
    %c0_0 = arith.constant 0 : index
    %0 = vector.load %arg1[%c0, %c0_0] : memref<128x384xbf16, #tpu.memory_space<vmem>>, vector<128x384xbf16>
    %c0_1 = arith.constant 0 : index
    %c0_2 = arith.constant 0 : index
    %1 = vector.load %arg2[%c0_1, %c0_2] : memref<384x128xbf16, #tpu.memory_space<vmem>>, vector<384x128xbf16>
    %cst = arith.constant dense<0.000000e+00> : vector<128x128xf32>
    %2 = tpu.matmul %0, %1, %cst {dimension_numbers = #tpu.dot_dimension_numbers<[1], [0], [0], [1], [0, 0, 1, 1], [], []>} : vector<128x384xbf16>, vector<384x128xbf16>, vector<128x128xf32> -> vector<128x128xf32>
    %c0_3 = arith.constant 0 : index
    %c0_4 = arith.constant 0 : index
    %3 = vector.load %arg3[%c0_3, %c0_4] : memref<1x128xf32, #tpu.memory_space<vmem>>, vector<1x128xf32>
    %4 = vector.broadcast %3 : vector<1x128xf32> to vector<128x128xf32>
    %5 = arith.addf %2, %4 : vector<128x128xf32>
    %cst_5 = arith.constant 0.000000e+00 : f32
    %6 = vector.broadcast %cst_5 : f32 to vector<128x128xf32>
    %7 = arith.maximumf %5, %6 : vector<128x128xf32>
    %c0_6 = arith.constant 0 : index
    %c0_7 = arith.constant 0 : index
    %8 = vector.load %arg4[%c0_6, %c0_7] : memref<128x128xf32, #tpu.memory_space<vmem>>, vector<128x128xf32>
    tpu.vector_store %arg4[%c0_6, %c0_7], %7 {strides = array<i32>} : memref<128x128xf32, #tpu.memory_space<vmem>>, vector<128x128xf32>,
    return
  }
  func.func @transform_0(%arg0: i32) -> (i32, i32) {
    %c0_i32 = arith.constant 0 : i32
    %c0_i32_0 = arith.constant 0 : i32
    return %arg0, %c0_i32 : i32, i32
  }
  func.func @transform_1(%arg0: i32) -> (i32, i32) {
    %c0_i32 = arith.constant 0 : i32
    %c0_i32_0 = arith.constant 0 : i32
    %c0_i32_1 = arith.constant 0 : i32
    return %c0_i32, %c0_i32_0 : i32, i32
  }
  func.func @transform_2(%arg0: i32) -> (i32, i32) {
    %c0_i32 = arith.constant 0 : i32
    %c0_i32_0 = arith.constant 0 : i32
    %c0_i32_1 = arith.constant 0 : i32
    return %c0_i32, %c0_i32_0 : i32, i32
  }
  func.func @transform_3(%arg0: i32) -> (i32, i32) {
    %c0_i32 = arith.constant 0 : i32
    %c0_i32_0 = arith.constant 0 : i32
    return %arg0, %c0_i32 : i32, i32
  }
}

module attributes {stable_mosaic.version = 11 : i64} {
  func.func @_mba_kernel(%arg0: i32, %arg1: memref<32x128xbf16, #tpu.memory_space<vmem>>, %arg2: memref<128x128xbf16, #tpu.memory_space<vmem>>, %arg3: memref<1x128xf32, #tpu.memory_space<vmem>>, %arg4: memref<32x128xf32, #tpu.memory_space<vmem>>) attributes {dimension_semantics = [#tpu.dimension_semantics<parallel>], iteration_bounds = array<i64: 1>, scalar_prefetch = 0 : i64, scratch_operands = 0 : i64, tpu.core_type = #tpu.core_type<tc>, window_params = [{transform_indices = @transform_0, window_bounds = array<i64: 32, 128>}, {pipeline_mode = #tpu.pipeline_mode<synchronous>, transform_indices = @transform_1, window_bounds = array<i64: 128, 128>}, {pipeline_mode = #tpu.pipeline_mode<synchronous>, transform_indices = @transform_2, window_bounds = array<i64: 1, 128>}, {transform_indices = @transform_3, window_bounds = array<i64: 32, 128>}]} {
    %c0 = arith.constant 0 : index
    %c0_0 = arith.constant 0 : index
    %0 = vector.load %arg1[%c0, %c0_0] : memref<32x128xbf16, #tpu.memory_space<vmem>>, vector<32x128xbf16>
    %c0_1 = arith.constant 0 : index
    %c0_2 = arith.constant 0 : index
    %1 = vector.load %arg2[%c0_1, %c0_2] : memref<128x128xbf16, #tpu.memory_space<vmem>>, vector<128x128xbf16>
    %cst = arith.constant dense<0.000000e+00> : vector<32x128xf32>
    %2 = tpu.matmul %0, %1, %cst {dimension_numbers = #tpu.dot_dimension_numbers<[1], [0], [0], [1], [0, 0, 1, 1], [], []>} : vector<32x128xbf16>, vector<128x128xbf16>, vector<32x128xf32> -> vector<32x128xf32>
    %c0_3 = arith.constant 0 : index
    %c0_4 = arith.constant 0 : index
    %3 = vector.load %arg3[%c0_3, %c0_4] : memref<1x128xf32, #tpu.memory_space<vmem>>, vector<1x128xf32>
    %4 = vector.broadcast %3 : vector<1x128xf32> to vector<32x128xf32>
    %5 = arith.addf %2, %4 : vector<32x128xf32>
    %cst_5 = arith.constant 0.000000e+00 : f32
    %6 = vector.broadcast %cst_5 : f32 to vector<32x128xf32>
    %7 = arith.maximumf %5, %6 : vector<32x128xf32>
    %c0_6 = arith.constant 0 : index
    %c0_7 = arith.constant 0 : index
    %8 = vector.load %arg4[%c0_6, %c0_7] : memref<32x128xf32, #tpu.memory_space<vmem>>, vector<32x128xf32>
    tpu.vector_store %arg4[%c0_6, %c0_7], %7 {strides = array<i32>} : memref<32x128xf32, #tpu.memory_space<vmem>>, vector<32x128xf32>,
    return
  }
  func.func @transform_0(%arg0: i32) -> (i32, i32) {
    %c0_i32 = arith.constant 0 : i32
    %c0_i32_0 = arith.constant 0 : i32
    return %arg0, %c0_i32 : i32, i32
  }
  func.func @transform_1(%arg0: i32) -> (i32, i32) {
    %c0_i32 = arith.constant 0 : i32
    %c0_i32_0 = arith.constant 0 : i32
    %c0_i32_1 = arith.constant 0 : i32
    return %c0_i32, %c0_i32_0 : i32, i32
  }
  func.func @transform_2(%arg0: i32) -> (i32, i32) {
    %c0_i32 = arith.constant 0 : i32
    %c0_i32_0 = arith.constant 0 : i32
    %c0_i32_1 = arith.constant 0 : i32
    return %c0_i32, %c0_i32_0 : i32, i32
  }
  func.func @transform_3(%arg0: i32) -> (i32, i32) {
    %c0_i32 = arith.constant 0 : i32
    %c0_i32_0 = arith.constant 0 : i32
    return %arg0, %c0_i32 : i32, i32
  }
}

module attributes {stable_mosaic.version = 11 : i64} {
  func.func @_mba_kernel(%arg0: i32, %arg1: memref<16x128xbf16, #tpu.memory_space<vmem>>, %arg2: memref<128x128xbf16, #tpu.memory_space<vmem>>, %arg3: memref<1x128xf32, #tpu.memory_space<vmem>>, %arg4: memref<16x128xf32, #tpu.memory_space<vmem>>) attributes {dimension_semantics = [#tpu.dimension_semantics<parallel>], iteration_bounds = array<i64: 1>, scalar_prefetch = 0 : i64, scratch_operands = 0 : i64, tpu.core_type = #tpu.core_type<tc>, window_params = [{transform_indices = @transform_0, window_bounds = array<i64: 16, 128>}, {pipeline_mode = #tpu.pipeline_mode<synchronous>, transform_indices = @transform_1, window_bounds = array<i64: 128, 128>}, {pipeline_mode = #tpu.pipeline_mode<synchronous>, transform_indices = @transform_2, window_bounds = array<i64: 1, 128>}, {transform_indices = @transform_3, window_bounds = array<i64: 16, 128>}]} {
    %c0 = arith.constant 0 : index
    %c0_0 = arith.constant 0 : index
    %0 = vector.load %arg1[%c0, %c0_0] : memref<16x128xbf16, #tpu.memory_space<vmem>>, vector<16x128xbf16>
    %c0_1 = arith.constant 0 : index
    %c0_2 = arith.constant 0 : index
    %1 = vector.load %arg2[%c0_1, %c0_2] : memref<128x128xbf16, #tpu.memory_space<vmem>>, vector<128x128xbf16>
    %cst = arith.constant dense<0.000000e+00> : vector<16x128xf32>
    %2 = tpu.matmul %0, %1, %cst {dimension_numbers = #tpu.dot_dimension_numbers<[1], [0], [0], [1], [0, 0, 1, 1], [], []>} : vector<16x128xbf16>, vector<128x128xbf16>, vector<16x128xf32> -> vector<16x128xf32>
    %c0_3 = arith.constant 0 : index
    %c0_4 = arith.constant 0 : index
    %3 = vector.load %arg3[%c0_3, %c0_4] : memref<1x128xf32, #tpu.memory_space<vmem>>, vector<1x128xf32>
    %4 = vector.broadcast %3 : vector<1x128xf32> to vector<16x128xf32>
    %5 = arith.addf %2, %4 : vector<16x128xf32>
    %cst_5 = arith.constant 0.000000e+00 : f32
    %6 = vector.broadcast %cst_5 : f32 to vector<16x128xf32>
    %7 = arith.maximumf %5, %6 : vector<16x128xf32>
    %c0_6 = arith.constant 0 : index
    %c0_7 = arith.constant 0 : index
    %8 = vector.load %arg4[%c0_6, %c0_7] : memref<16x128xf32, #tpu.memory_space<vmem>>, vector<16x128xf32>
    tpu.vector_store %arg4[%c0_6, %c0_7], %7 {strides = array<i32>} : memref<16x128xf32, #tpu.memory_space<vmem>>, vector<16x128xf32>,
    return
  }
  func.func @transform_0(%arg0: i32) -> (i32, i32) {
    %c0_i32 = arith.constant 0 : i32
    %c0_i32_0 = arith.constant 0 : i32
    return %arg0, %c0_i32 : i32, i32
  }
  func.func @transform_1(%arg0: i32) -> (i32, i32) {
    %c0_i32 = arith.constant 0 : i32
    %c0_i32_0 = arith.constant 0 : i32
    %c0_i32_1 = arith.constant 0 : i32
    return %c0_i32, %c0_i32_0 : i32, i32
  }
  func.func @transform_2(%arg0: i32) -> (i32, i32) {
    %c0_i32 = arith.constant 0 : i32
    %c0_i32_0 = arith.constant 0 : i32
    %c0_i32_1 = arith.constant 0 : i32
    return %c0_i32, %c0_i32_0 : i32, i32
  }
  func.func @transform_3(%arg0: i32) -> (i32, i32) {
    %c0_i32 = arith.constant 0 : i32
    %c0_i32_0 = arith.constant 0 : i32
    return %arg0, %c0_i32 : i32, i32
  }
}

module attributes {stable_mosaic.version = 11 : i64} {
  func.func @_mba_kernel(%arg0: i32, %arg1: memref<128x128xbf16, #tpu.memory_space<vmem>>, %arg2: memref<128x128xbf16, #tpu.memory_space<vmem>>, %arg3: memref<1x128xf32, #tpu.memory_space<vmem>>, %arg4: memref<128x128xf32, #tpu.memory_space<vmem>>) attributes {dimension_semantics = [#tpu.dimension_semantics<parallel>], iteration_bounds = array<i64: 1>, scalar_prefetch = 0 : i64, scratch_operands = 0 : i64, tpu.core_type = #tpu.core_type<tc>, window_params = [{transform_indices = @transform_0, window_bounds = array<i64: 128, 128>}, {pipeline_mode = #tpu.pipeline_mode<synchronous>, transform_indices = @transform_1, window_bounds = array<i64: 128, 128>}, {pipeline_mode = #tpu.pipeline_mode<synchronous>, transform_indices = @transform_2, window_bounds = array<i64: 1, 128>}, {transform_indices = @transform_3, window_bounds = array<i64: 128, 128>}]} {
    %c0 = arith.constant 0 : index
    %c0_0 = arith.constant 0 : index
    %0 = vector.load %arg1[%c0, %c0_0] : memref<128x128xbf16, #tpu.memory_space<vmem>>, vector<128x128xbf16>
    %c0_1 = arith.constant 0 : index
    %c0_2 = arith.constant 0 : index
    %1 = vector.load %arg2[%c0_1, %c0_2] : memref<128x128xbf16, #tpu.memory_space<vmem>>, vector<128x128xbf16>
    %cst = arith.constant dense<0.000000e+00> : vector<128x128xf32>
    %2 = tpu.matmul %0, %1, %cst {dimension_numbers = #tpu.dot_dimension_numbers<[1], [0], [0], [1], [0, 0, 1, 1], [], []>} : vector<128x128xbf16>, vector<128x128xbf16>, vector<128x128xf32> -> vector<128x128xf32>
    %c0_3 = arith.constant 0 : index
    %c0_4 = arith.constant 0 : index
    %3 = vector.load %arg3[%c0_3, %c0_4] : memref<1x128xf32, #tpu.memory_space<vmem>>, vector<1x128xf32>
    %4 = vector.broadcast %3 : vector<1x128xf32> to vector<128x128xf32>
    %5 = arith.addf %2, %4 : vector<128x128xf32>
    %cst_5 = arith.constant 0.000000e+00 : f32
    %6 = vector.broadcast %cst_5 : f32 to vector<128x128xf32>
    %7 = arith.maximumf %5, %6 : vector<128x128xf32>
    %c0_6 = arith.constant 0 : index
    %c0_7 = arith.constant 0 : index
    %8 = vector.load %arg4[%c0_6, %c0_7] : memref<128x128xf32, #tpu.memory_space<vmem>>, vector<128x128xf32>
    tpu.vector_store %arg4[%c0_6, %c0_7], %7 {strides = array<i32>} : memref<128x128xf32, #tpu.memory_space<vmem>>, vector<128x128xf32>,
    return
  }
  func.func @transform_0(%arg0: i32) -> (i32, i32) {
    %c0_i32 = arith.constant 0 : i32
    %c0_i32_0 = arith.constant 0 : i32
    return %arg0, %c0_i32 : i32, i32
  }
  func.func @transform_1(%arg0: i32) -> (i32, i32) {
    %c0_i32 = arith.constant 0 : i32
    %c0_i32_0 = arith.constant 0 : i32
    %c0_i32_1 = arith.constant 0 : i32
    return %c0_i32, %c0_i32_0 : i32, i32
  }
  func.func @transform_2(%arg0: i32) -> (i32, i32) {
    %c0_i32 = arith.constant 0 : i32
    %c0_i32_0 = arith.constant 0 : i32
    %c0_i32_1 = arith.constant 0 : i32
    return %c0_i32, %c0_i32_0 : i32, i32
  }
  func.func @transform_3(%arg0: i32) -> (i32, i32) {
    %c0_i32 = arith.constant 0 : i32
    %c0_i32_0 = arith.constant 0 : i32
    return %arg0, %c0_i32 : i32, i32
  }
}

module attributes {stable_mosaic.version = 11 : i64} {
  func.func @_mba_kernel(%arg0: i32, %arg1: memref<256x128xbf16, #tpu.memory_space<vmem>>, %arg2: memref<128x128xbf16, #tpu.memory_space<vmem>>, %arg3: memref<1x128xf32, #tpu.memory_space<vmem>>, %arg4: memref<256x128xf32, #tpu.memory_space<vmem>>) attributes {dimension_semantics = [#tpu.dimension_semantics<parallel>], iteration_bounds = array<i64: 1>, scalar_prefetch = 0 : i64, scratch_operands = 0 : i64, tpu.core_type = #tpu.core_type<tc>, window_params = [{transform_indices = @transform_0, window_bounds = array<i64: 256, 128>}, {pipeline_mode = #tpu.pipeline_mode<synchronous>, transform_indices = @transform_1, window_bounds = array<i64: 128, 128>}, {pipeline_mode = #tpu.pipeline_mode<synchronous>, transform_indices = @transform_2, window_bounds = array<i64: 1, 128>}, {transform_indices = @transform_3, window_bounds = array<i64: 256, 128>}]} {
    %c0 = arith.constant 0 : index
    %c0_0 = arith.constant 0 : index
    %0 = vector.load %arg1[%c0, %c0_0] : memref<256x128xbf16, #tpu.memory_space<vmem>>, vector<256x128xbf16>
    %c0_1 = arith.constant 0 : index
    %c0_2 = arith.constant 0 : index
    %1 = vector.load %arg2[%c0_1, %c0_2] : memref<128x128xbf16, #tpu.memory_space<vmem>>, vector<128x128xbf16>
    %cst = arith.constant dense<0.000000e+00> : vector<256x128xf32>
    %2 = tpu.matmul %0, %1, %cst {dimension_numbers = #tpu.dot_dimension_numbers<[1], [0], [0], [1], [0, 0, 1, 1], [], []>} : vector<256x128xbf16>, vector<128x128xbf16>, vector<256x128xf32> -> vector<256x128xf32>
    %c0_3 = arith.constant 0 : index
    %c0_4 = arith.constant 0 : index
    %3 = vector.load %arg3[%c0_3, %c0_4] : memref<1x128xf32, #tpu.memory_space<vmem>>, vector<1x128xf32>
    %4 = vector.broadcast %3 : vector<1x128xf32> to vector<256x128xf32>
    %5 = arith.addf %2, %4 : vector<256x128xf32>
    %cst_5 = arith.constant 0.000000e+00 : f32
    %6 = vector.broadcast %cst_5 : f32 to vector<256x128xf32>
    %7 = arith.maximumf %5, %6 : vector<256x128xf32>
    %c0_6 = arith.constant 0 : index
    %c0_7 = arith.constant 0 : index
    %8 = vector.load %arg4[%c0_6, %c0_7] : memref<256x128xf32, #tpu.memory_space<vmem>>, vector<256x128xf32>
    tpu.vector_store %arg4[%c0_6, %c0_7], %7 {strides = array<i32>} : memref<256x128xf32, #tpu.memory_space<vmem>>, vector<256x128xf32>,
    return
  }
  func.func @transform_0(%arg0: i32) -> (i32, i32) {
    %c0_i32 = arith.constant 0 : i32
    %c0_i32_0 = arith.constant 0 : i32
    return %arg0, %c0_i32 : i32, i32
  }
  func.func @transform_1(%arg0: i32) -> (i32, i32) {
    %c0_i32 = arith.constant 0 : i32
    %c0_i32_0 = arith.constant 0 : i32
    %c0_i32_1 = arith.constant 0 : i32
    return %c0_i32, %c0_i32_0 : i32, i32
  }
  func.func @transform_2(%arg0: i32) -> (i32, i32) {
    %c0_i32 = arith.constant 0 : i32
    %c0_i32_0 = arith.constant 0 : i32
    %c0_i32_1 = arith.constant 0 : i32
    return %c0_i32, %c0_i32_0 : i32, i32
  }
  func.func @transform_3(%arg0: i32) -> (i32, i32) {
    %c0_i32 = arith.constant 0 : i32
    %c0_i32_0 = arith.constant 0 : i32
    return %arg0, %c0_i32 : i32, i32
  }
}

module attributes {stable_mosaic.version = 11 : i64} {
  func.func @_attn_kernel(%arg0: i32, %arg1: memref<8x32xf32, #tpu.memory_space<vmem>>, %arg2: memref<32x32xf32, #tpu.memory_space<vmem>>, %arg3: memref<1x32xf32, #tpu.memory_space<vmem>>, %arg4: memref<1x128x32xf32, #tpu.memory_space<vmem>>, %arg5: memref<1x128x32xf32, #tpu.memory_space<vmem>>, %arg6: memref<1x8x32xf32, #tpu.memory_space<vmem>>, %arg7: memref<1x8x128xf32, #tpu.memory_space<vmem>>) attributes {dimension_semantics = [#tpu.dimension_semantics<parallel>], iteration_bounds = array<i64: 2>, scalar_prefetch = 0 : i64, scratch_operands = 0 : i64, tpu.core_type = #tpu.core_type<tc>, window_params = [{pipeline_mode = #tpu.pipeline_mode<synchronous>, transform_indices = @transform_0, window_bounds = array<i64: 8, 32>}, {pipeline_mode = #tpu.pipeline_mode<synchronous>, transform_indices = @transform_1, window_bounds = array<i64: 32, 32>}, {pipeline_mode = #tpu.pipeline_mode<synchronous>, transform_indices = @transform_2, window_bounds = array<i64: 1, 32>}, {transform_indices = @transform_3, window_bounds = array<i64: 1, 128, 32>}, {transform_indices = @transform_4, window_bounds = array<i64: 1, 128, 32>}, {transform_indices = @transform_5, window_bounds = array<i64: 1, 8, 32>}, {transform_indices = @transform_6, window_bounds = array<i64: 1, 8, 128>}]} {
    %c0 = arith.constant 0 : index
    %c0_0 = arith.constant 0 : index
    %0 = vector.load %arg1[%c0, %c0_0] : memref<8x32xf32, #tpu.memory_space<vmem>>, vector<8x32xf32>
    %c0_1 = arith.constant 0 : index
    %c0_2 = arith.constant 0 : index
    %1 = vector.load %arg2[%c0_1, %c0_2] : memref<32x32xf32, #tpu.memory_space<vmem>>, vector<32x32xf32>
    %cst = arith.constant dense<0.000000e+00> : vector<8x32xf32>
    %2 = tpu.matmul %0, %1, %cst {dimension_numbers = #tpu.dot_dimension_numbers<[1], [0], [0], [1], [0, 0, 1, 1], [], []>} : vector<8x32xf32>, vector<32x32xf32>, vector<8x32xf32> -> vector<8x32xf32>
    %c0_3 = arith.constant 0 : index
    %c0_4 = arith.constant 0 : index
    %3 = vector.load %arg3[%c0_3, %c0_4] : memref<1x32xf32, #tpu.memory_space<vmem>>, vector<1x32xf32>
    %4 = vector.broadcast %3 : vector<1x32xf32> to vector<8x32xf32>
    %5 = arith.addf %2, %4 : vector<8x32xf32>
    %c0_5 = arith.constant 0 : index
    %c0_6 = arith.constant 0 : index
    %c0_7 = arith.constant 0 : index
    %6 = vector.load %arg4[%c0_5, %c0_6, %c0_7] : memref<1x128x32xf32, #tpu.memory_space<vmem>>, vector<1x128x32xf32>
    %7 = vector.shape_cast %6 : vector<1x128x32xf32> to vector<128x32xf32>
    %c0_8 = arith.constant 0 : index
    %c0_9 = arith.constant 0 : index
    %c0_10 = arith.constant 0 : index
    %8 = vector.load %arg5[%c0_8, %c0_9, %c0_10] : memref<1x128x32xf32, #tpu.memory_space<vmem>>, vector<1x128x32xf32>
    %9 = vector.shape_cast %8 : vector<1x128x32xf32> to vector<128x32xf32>
    "tpu.trace_start"() <{level = 10 : i32, message = "te,se->ts"}> : () -> ()
    %cst_11 = arith.constant dense<0.000000e+00> : vector<8x128xf32>
    %10 = tpu.matmul %5, %7, %cst_11 {dimension_numbers = #tpu.dot_dimension_numbers<[1], [1], [0], [0], [0, 0, 1, 0], [], []>} : vector<8x32xf32>, vector<128x32xf32>, vector<8x128xf32> -> vector<8x128xf32>
    "tpu.trace_stop"() : () -> ()
    %cst_12 = arith.constant 0.176776692 : f32
    %11 = vector.broadcast %cst_12 : f32 to vector<8x128xf32>
    %12 = arith.mulf %10, %11 : vector<8x128xf32>
    %cst_13 = arith.constant dense<0xFF800000> : vector<8xf32>
    %13 = vector.multi_reduction <maximumf>, %12, %cst_13 [1] : vector<8x128xf32> to vector<8xf32>
    %14 = vector.shape_cast %13 : vector<8xf32> to vector<8x1xf32>
    %15 = vector.broadcast %14 : vector<8x1xf32> to vector<8x128xf32>
    %16 = arith.subf %12, %15 : vector<8x128xf32>
    %17 = math.exp %16 : vector<8x128xf32>
    %cst_14 = arith.constant dense<0.000000e+00> : vector<8xf32>
    %18 = vector.multi_reduction <add>, %17, %cst_14 [1] : vector<8x128xf32> to vector<8xf32>
    %19 = vector.shape_cast %18 : vector<8xf32> to vector<8x1xf32>
    %20 = tpu.reciprocal %19 {approx = true} : vector<8x1xf32> -> vector<8x1xf32>
    %21 = vector.broadcast %20 : vector<8x1xf32> to vector<8x128xf32>
    %22 = arith.mulf %17, %21 : vector<8x128xf32>
    %cst_15 = arith.constant dense<0.000000e+00> : vector<8x32xf32>
    %23 = tpu.matmul %22, %9, %cst_15 {dimension_numbers = #tpu.dot_dimension_numbers<[1], [0], [0], [1], [0, 0, 1, 1], [], []>} : vector<8x128xf32>, vector<128x32xf32>, vector<8x32xf32> -> vector<8x32xf32>
    %c0_16 = arith.constant 0 : index
    %c0_17 = arith.constant 0 : index
    %c0_18 = arith.constant 0 : index
    %24 = vector.load %arg6[%c0_16, %c0_17, %c0_18] : memref<1x8x32xf32, #tpu.memory_space<vmem>>, vector<1x8x32xf32>
    %25 = vector.shape_cast %24 : vector<1x8x32xf32> to vector<8x32xf32>
    %26 = vector.shape_cast %23 : vector<8x32xf32> to vector<1x8x32xf32>
    tpu.vector_store %arg6[%c0_16, %c0_17, %c0_18], %26 {strides = array<i32>} : memref<1x8x32xf32, #tpu.memory_space<vmem>>, vector<1x8x32xf32>,
    %c0_19 = arith.constant 0 : index
    %c0_20 = arith.constant 0 : index
    %c0_21 = arith.constant 0 : index
    %27 = vector.load %arg7[%c0_19, %c0_20, %c0_21] : memref<1x8x128xf32, #tpu.memory_space<vmem>>, vector<1x8x128xf32>
    %28 = vector.shape_cast %27 : vector<1x8x128xf32> to vector<8x128xf32>
    %29 = vector.shape_cast %22 : vector<8x128xf32> to vector<1x8x128xf32>
    tpu.vector_store %arg7[%c0_19, %c0_20, %c0_21], %29 {strides = array<i32>} : memref<1x8x128xf32, #tpu.memory_space<vmem>>, vector<1x8x128xf32>,
    return
  }
  func.func @transform_0(%arg0: i32) -> (i32, i32) {
    %c0_i32 = arith.constant 0 : i32
    %c0_i32_0 = arith.constant 0 : i32
    %c0_i32_1 = arith.constant 0 : i32
    return %c0_i32, %c0_i32_0 : i32, i32
  }
  func.func @transform_1(%arg0: i32) -> (i32, i32) {
    %c0_i32 = arith.constant 0 : i32
    %c0_i32_0 = arith.constant 0 : i32
    %c0_i32_1 = arith.constant 0 : i32
    return %c0_i32, %c0_i32_0 : i32, i32
  }
  func.func @transform_2(%arg0: i32) -> (i32, i32) {
    %c0_i32 = arith.constant 0 : i32
    %c0_i32_0 = arith.constant 0 : i32
    %c0_i32_1 = arith.constant 0 : i32
    return %c0_i32, %c0_i32_0 : i32, i32
  }
  func.func @transform_3(%arg0: i32) -> (i32, i32, i32) {
    %c0_i32 = arith.constant 0 : i32
    %c0_i32_0 = arith.constant 0 : i32
    %c0_i32_1 = arith.constant 0 : i32
    return %arg0, %c0_i32, %c0_i32_0 : i32, i32, i32
  }
  func.func @transform_4(%arg0: i32) -> (i32, i32, i32) {
    %c0_i32 = arith.constant 0 : i32
    %c0_i32_0 = arith.constant 0 : i32
    %c0_i32_1 = arith.constant 0 : i32
    return %arg0, %c0_i32, %c0_i32_0 : i32, i32, i32
  }
  func.func @transform_5(%arg0: i32) -> (i32, i32, i32) {
    %c0_i32 = arith.constant 0 : i32
    %c0_i32_0 = arith.constant 0 : i32
    %c0_i32_1 = arith.constant 0 : i32
    return %arg0, %c0_i32, %c0_i32_0 : i32, i32, i32
  }
  func.func @transform_6(%arg0: i32) -> (i32, i32, i32) {
    %c0_i32 = arith.constant 0 : i32
    %c0_i32_0 = arith.constant 0 : i32
    %c0_i32_1 = arith.constant 0 : i32
    return %arg0, %c0_i32, %c0_i32_0 : i32, i32, i32
  }
}

</mosaic_0001>

<bundles_post_ra>
// kernel: _lambda_.10
= control target key start
LH: loop header
LB: loop body
LE: loop exit
PB: predicated region body
PF: predicated region fallthrough
CT: control target
= control target key end

     0   :  { %s279_s1 = inlined_call_operand.vmem [shape: bf16[128,128], index: 1, kind: input, shape index: {}]   ;;  %s280_s0 = inlined_call_operand.vmem [shape: bf16[32,128], index: 0, kind: input, shape index: {}]   ;;  %s281_s2 = inlined_call_operand.vmem [shape: f32[1,128], index: 2, kind: input, shape index: {}]   ;;  %s282_s3 = inlined_call_operand.vmem [shape: f32[32,128], index: 3, kind: output, shape index: {}]  }
   0x1   :  { %v204_v0 = vld [vmem:[%s279_s1 + $0x38] sm:$0xff]   ;;  %v205_v1 = vld [vmem:[%s279_s1 + $0x30] sm:$0xff]   ;;  %v206_v2 = vld [vmem:[%s279_s1 + $0x28] sm:$0xff]  }
   0x2   :  { %184 = vmatprep.subr.bf16.mxu0 %v204_v0  ;;  %v207_v3 = vld [vmem:[%s279_s1 + $0x20] sm:$0xff]   ;;  %v208_v5 = vld [vmem:[%s279_s1 + $0x18] sm:$0xff]   ;;  %v209_v6 = vld [vmem:[%s279_s1 + $0x10] sm:$0xff]  }
   0x3   :  { %185 = vmatpush3.bf16.msra.mxu0 %v204_v0  ;;  %v212_v4 = vld [vmem:[%s280_s0] sm:$0xff]   ;;  %v210_v7 = vld [vmem:[%s279_s1 + $0x8] sm:$0xff]  }
   0x4   :  { %186 = vmatprep.subr.bf16.mxu0 %v205_v1  ;;  %200 = vmatprep.mubr.bf16.mxu0 %v212_v4  ;;  %v211_v8 = vld [vmem:[%s279_s1] sm:$0xff]   ;;  %v213_v9 = vld [vmem:[%s280_s0 + $0x8] sm:$0xff]  }
   0x5   :  { %v163_v10 = vld [vmem:[%s281_s2] ss:$0 sm:$0xff] }
   0x7   :  { %187 = vmatpush3.bf16.msra.mxu0 %v205_v1 }
   0x8   :  { %188 = vmatprep.subr.bf16.mxu0 %v206_v2 }
   0xb   :  { %189 = vmatpush3.bf16.msra.mxu0 %v206_v2 }
   0xc   :  { %190 = vmatprep.subr.bf16.mxu0 %v207_v3 }
   0xf   :  { %191 = vmatpush3.bf16.msra.mxu0 %v207_v3 }
  0x10   :  { %192 = vmatprep.subr.bf16.mxu0 %v208_v5 }
  0x13   :  { %193 = vmatpush3.bf16.msra.mxu0 %v208_v5 }
  0x14   :  { %194 = vmatprep.subr.bf16.mxu0 %v209_v6 }
  0x17   :  { %195 = vmatpush3.bf16.msra.mxu0 %v209_v6 }
  0x18   :  { %196 = vmatprep.subr.bf16.mxu0 %v210_v7 }
  0x1b   :  { %197 = vmatpush3.bf16.msra.mxu0 %v210_v7 }
  0x1c   :  { %198 = vmatprep.subr.bf16.mxu0 %v211_v8 }
  0x1f   :  { %199 = vmatpush3.bf16.msra.mxu0 %v211_v8 }
  0x22   :  { %201 = vmatmul.mubr.bf16.vlgmr.msra.gmra.mxu0 %v213_v9 }
  0xe2   :  { %v202_v11 = vpop.f32.mrf.mxu0 }
  0xe3   :  { %v145_v12 = vadd.f32 %v202_v11, %v163_v10 }
  0xe4   :  { %v136_v13 = vpop.f32.mrf.mxu0 }
  0xe5   :  { %v153_v14 = vmax.f32 %v145_v12, 0.0  ;;  %v137_v15 = vadd.f32 %v163_v10, %v136_v13 }
  0xe6   :  { %v203_v16 = vpop.f32.mrf.mxu0 }
  0xe7   :  { %157 = vst [vmem:[%s282_s3 + $0x10] sm:$0xff] %v153_v14  ;;  %v151_v17 = vmax.f32 %v137_v15, 0.0  ;;  %v148_v18 = vadd.f32 %v203_v16, %v163_v10 }
  0xe8   :  { %v139_v19 = vpop.f32.mrf.mxu0 }
  0xe9   :  { %155 = vst [vmem:[%s282_s3] sm:$0xff] %v151_v17  ;;  %v154_v20 = vmax.f32 %v148_v18, 0.0  ;;  %v140_v21 = vadd.f32 %v163_v10, %v139_v19 }
  0xeb   :  { %158 = vst [vmem:[%s282_s3 + $0x18] sm:$0xff] %v154_v20  ;;  %v152_v22 = vmax.f32 %v140_v21, 0.0 }
  0xed   :  { %156 = vst [vmem:[%s282_s3 + $0x8] sm:$0xff] %v152_v22 }

// kernel: _lambda_.9
= control target key start
LH: loop header
LB: loop body
LE: loop exit
PB: predicated region body
PF: predicated region fallthrough
CT: control target
= control target key end

     0   :  { %s1054_s1 = inlined_call_operand.vmem [shape: bf16[384,128], index: 1, kind: input, shape index: {}]   ;;  %s1055_s0 = inlined_call_operand.vmem [shape: bf16[128,384], index: 0, kind: input, shape index: {}]   ;;  %s1056_s2 = inlined_call_operand.vmem [shape: f32[1,128], index: 2, kind: input, shape index: {}]   ;;  %s1057_s3 = inlined_call_operand.vmem [shape: f32[128,128], index: 3, kind: output, shape index: {}]  }
   0x1   :  { %v765_v0 = vld [vmem:[%s1054_s1 + $0x78] sm:$0xff]   ;;  %v767_v2 = vld [vmem:[%s1054_s1 + $0x70] sm:$0xff]   ;;  %v770_v5 = vld [vmem:[%s1054_s1 + $0x68] sm:$0xff]  }
   0x2   :  { %v766_v1 = vld [vmem:[%s1054_s1 + $0x38] sm:$0xff]   ;;  %653 = vmatprep.subr.bf16.mxu0 %v765_v0  ;;  %v769_v4 = vld [vmem:[%s1054_s1 + $0x30] sm:$0xff]   ;;  %v772_v7 = vld [vmem:[%s1054_s1 + $0x28] sm:$0xff]  }
   0x3   :  { %654 = vmatpush3.bf16.msra.mxu0 %v766_v1  ;;  %v768_v3 = vld [vmem:[%s1054_s1 + $0xb8] sm:$0xff]   ;;  %v771_v6 = vld [vmem:[%s1054_s1 + $0xb0] sm:$0xff]   ;;  %v773_v8 = vld [vmem:[%s1054_s1 + $0x60] sm:$0xff]  }
   0x4   :  { %655 = vmatprep.subr.bf16.mxu0 %v767_v2  ;;  %733 = vmatprep.subr.bf16.mxu1 %v768_v3  ;;  %v774_v9 = vld [vmem:[%s1054_s1 + $0xa8] sm:$0xff]   ;;  %v775_v10 = vld [vmem:[%s1054_s1 + $0x20] sm:$0xff]   ;;  %v776_v11 = vld [vmem:[%s1054_s1 + $0x58] sm:$0xff]  }
   0x5   :  { %734 = vmatpush3.bf16.msra.mxu1 %v768_v3  ;;  %v777_v12 = vld [vmem:[%s1054_s1 + $0xa0] sm:$0xff]   ;;  %v778_v13 = vld [vmem:[%s1054_s1 + $0x18] sm:$0xff]   ;;  %v779_v15 = vld [vmem:[%s1054_s1 + $0x50] sm:$0xff]  }
   0x6   :  { %735 = vmatprep.subr.bf16.mxu1 %v771_v6  ;;  %v780_v14 = vld [vmem:[%s1054_s1 + $0x98] sm:$0xff]   ;;  %v781_v16 = vld [vmem:[%s1054_s1 + $0x10] sm:$0xff]   ;;  %v782_v18 = vld [vmem:[%s1054_s1 + $0x48] sm:$0xff]  }
   0x7   :  { %656 = vmatpush3.bf16.msra.mxu0 %v769_v4  ;;  %v783_v17 = vld [vmem:[%s1054_s1 + $0x90] sm:$0xff]   ;;  %v784_v19 = vld [vmem:[%s1054_s1 + $0x8] sm:$0xff]   ;;  %v785_v20 = vld [vmem:[%s1054_s1 + $0x40] sm:$0xff]  }
   0x8   :  { %657 = vmatprep.subr.bf16.mxu0 %v770_v5  ;;  %v786_v21 = vld [vmem:[%s1054_s1 + $0x88] sm:$0xff]   ;;  %v790_v22 = vld [vmem:[%s1055_s0 + $0x4] ss:$12 sps:$4 sm:$0xff]   ;;  %v797_v31 = vld [vmem:[%s1055_s0 + $0x34] ss:$12 sps:$4 sm:$0xff]  }
   0x9   :  { %736 = vmatpush3.bf16.msra.mxu1 %v771_v6  ;;  %v787_v23 = vld [vmem:[%s1054_s1] sm:$0xff]   ;;  %406 = vmatprep.mubr.bf16.mxu0 %v790_v22  ;;  %v792_v24 = vld [vmem:[%s1055_s0 + $0x8] ss:$12 sps:$4 sm:$0xff]   ;;  %v801_v32 = vld [vmem:[%s1055_s0 + $0x50] ss:$12 sps:$4 sm:$0xff]  }
   0xa   :  { %737 = vmatprep.subr.bf16.mxu1 %v774_v9  ;;  %v791_v25 = vld [vmem:[%s1054_s1 + $0x80] sm:$0xff]   ;;  %749 = vmatprep.mubr.bf16.mxu1 %v792_v24  ;;  %v794_v27 = vld [vmem:[%s1055_s0 + $0x1c] ss:$12 sps:$4 sm:$0xff]   ;;  %v802_v35 = vld [vmem:[%s1055_s0 + $0x4c] ss:$12 sps:$4 sm:$0xff]  }
   0xb   :  { %658 = vmatpush3.bf16.msra.mxu0 %v772_v7  ;;  %v788_v26 = vld [vmem:[%s1055_s0] ss:$12 sps:$4 sm:$0xff]   ;;  %v800_v29 = vld [vmem:[%s1055_s0 + $0x38] ss:$12 sps:$4 sm:$0xff]   ;;  %v808_v33 = vld [vmem:[%s1055_s0 + $0x68] ss:$12 sps:$4 sm:$0xff]  }
   0xc   :  { %659 = vmatprep.subr.bf16.mxu0 %v773_v8  ;;  %v793_v28 = vld [vmem:[%s1055_s0 + $0x20] ss:$12 sps:$4 sm:$0xff]   ;;  %v796_v30 = vld [vmem:[%s1055_s0 + $0x18] ss:$12 sps:$4 sm:$0xff]   ;;  %v799_v34 = vld [vmem:[%s1055_s0 + $0x30] ss:$12 sps:$4 sm:$0xff]  }
   0xd   :  { %738 = vmatpush3.bf16.msra.mxu1 %v774_v9  ;;  %v809_v36 = vld [vmem:[%s1055_s0 + $0x80] ss:$12 sps:$4 sm:$0xff]   ;;  %v816_v37 = vld [vmem:[%s1055_s0 + $0x98] ss:$12 sps:$4 sm:$0xff]   ;;  %v804_v38 = vld [vmem:[%s1055_s0 + $0x48] ss:$12 sps:$4 sm:$0xff]  }
   0xe   :  { %739 = vmatprep.subr.bf16.mxu1 %v777_v12  ;;  %v805_v39 = vld [vmem:[%s1055_s0 + $0x64] ss:$12 sps:$4 sm:$0xff]   ;;  %v807_v41 = vld [vmem:[%s1055_s0 + $0x60] ss:$12 sps:$4 sm:$0xff]   ;;  %v810_v42 = vld [vmem:[%s1055_s0 + $0x7c] ss:$12 sps:$4 sm:$0xff]  }
   0xf   :  { %660 = vmatpush3.bf16.msra.mxu0 %v775_v10  ;;  %v817_v40 = vld [vmem:[%s1055_s0 + $0xb0] ss:$12 sps:$4 sm:$0xff]   ;;  %v812_v43 = vld [vmem:[%s1055_s0 + $0x78] ss:$12 sps:$4 sm:$0xff]   ;;  %v813_v44 = vld [vmem:[%s1055_s0 + $0x94] ss:$12 sps:$4 sm:$0xff]  }
  0x10   :  { %661 = vmatprep.subr.bf16.mxu0 %v776_v11  ;;  %v815_v45 = vld [vmem:[%s1055_s0 + $0x90] ss:$12 sps:$4 sm:$0xff]   ;;  %v818_v46 = vld [vmem:[%s1055_s0 + $0xac] ss:$12 sps:$4 sm:$0xff]   ;;  %v820_v47 = vld [vmem:[%s1055_s0 + $0xa8] ss:$12 sps:$4 sm:$0xff]  }
  0x11   :  { %740 = vmatpush3.bf16.msra.mxu1 %v777_v12  ;;  %v988_v50 = vld [vmem:[%s1056_s2] ss:$0 sm:$0xff] }
  0x12   :  { %741 = vmatprep.subr.bf16.mxu1 %v780_v14 }
  0x13   :  { %662 = vmatpush3.bf16.msra.mxu0 %v778_v13 }
  0x14   :  { %663 = vmatprep.subr.bf16.mxu0 %v779_v15 }
  0x15   :  { %742 = vmatpush3.bf16.msra.mxu1 %v780_v14 }
  0x16   :  { %743 = vmatprep.subr.bf16.mxu1 %v783_v17 }
  0x17   :  { %664 = vmatpush3.bf16.msra.mxu0 %v781_v16 }
  0x18   :  { %665 = vmatprep.subr.bf16.mxu0 %v782_v18 }
  0x19   :  { %744 = vmatpush3.bf16.msra.mxu1 %v783_v17 }
  0x1a   :  { %745 = vmatprep.subr.bf16.mxu1 %v786_v21 }
  0x1b   :  { %666 = vmatpush3.bf16.msra.mxu0 %v784_v19 }
  0x1c   :  { %667 = vmatprep.subr.bf16.mxu0 %v785_v20 }
  0x1d   :  { %746 = vmatpush3.bf16.msra.mxu1 %v786_v21 }
  0x1e   :  { %747 = vmatprep.subr.bf16.mxu1 %v791_v25 }
  0x1f   :  { %668 = vmatpush3.bf16.msra.mxu0 %v787_v23 }
  0x21   :  { %748 = vmatpush3.bf16.msra.mxu1 %v791_v25 }
  0x22   :  { %407 = vmatmul.mubr.bf16.vlgmr.msra.gmra.mxu0 %v788_v26 }
  0x23   :  { %414 = vmatprep.mubr.bf16.mxu0 %v794_v27 }
  0x24   :  { %750 = vmatmul.mubr.bf16.vlgmr.msra.gmra.mxu1 %v793_v28 }
  0x25   :  { %753 = vmatprep.mubr.bf16.mxu1 %v800_v29 }
  0x2a   :  { %415 = vmatmul.mubr.bf16.gmra.mxu0 %v796_v30 }
  0x2b   :  { %422 = vmatprep.mubr.bf16.mxu0 %v797_v31 }
  0x2c   :  { %754 = vmatmul.mubr.bf16.gmra.mxu1 %v801_v32 }
  0x2d   :  { %757 = vmatprep.mubr.bf16.mxu1 %v808_v33 }
  0x32   :  { %423 = vmatmul.mubr.bf16.gmra.mxu0 %v799_v34 }
  0x33   :  { %430 = vmatprep.mubr.bf16.mxu0 %v802_v35 }
  0x34   :  { %758 = vmatmul.mubr.bf16.gmra.mxu1 %v809_v36 }
  0x35   :  { %761 = vmatprep.mubr.bf16.mxu1 %v816_v37 }
  0x3a   :  { %431 = vmatmul.mubr.bf16.gmra.mxu0 %v804_v38 }
  0x3b   :  { %438 = vmatprep.mubr.bf16.mxu0 %v805_v39 }
  0x3c   :  { %762 = vmatmul.mubr.bf16.gmra.mxu1 %v817_v40 }
  0x42   :  { %439 = vmatmul.mubr.bf16.gmra.mxu0 %v807_v41 }
  0x43   :  { %446 = vmatprep.mubr.bf16.mxu0 %v810_v42 }
  0x4a   :  { %447 = vmatmul.mubr.bf16.gmra.mxu0 %v812_v43 }
  0x4b   :  { %454 = vmatprep.mubr.bf16.mxu0 %v813_v44 }
  0x52   :  { %455 = vmatmul.mubr.bf16.gmra.mxu0 %v815_v45 }
  0x53   :  { %462 = vmatprep.mubr.bf16.mxu0 %v818_v46 }
  0x5a   :  { %463 = vmatmul.mubr.bf16.gmra.mxu0 %v820_v47 }
  0xe2   :  { %v669_v48 = vpop.f32.mrf.mxu0 }
  0xe4   :  { %v670_v49 = vpop.f32.mrf.mxu0  ;;  %v751_v52 = vpop.f32.mrf.mxu1 }
  0xe5   :  { %v671_v51 = vadd.f32 %v670_v49, %v669_v48 }
  0xe6   :  { %v672_v53 = vpop.f32.mrf.mxu0  ;;  %v505_v55 = vpop.f32.mrf.mxu1 }
  0xe7   :  { %v409_v54 = vadd.f32 %v671_v51, %v988_v50 }
  0xe8   :  { %v673_v56 = vpop.f32.mrf.mxu0  ;;  %v752_v59 = vpop.f32.mrf.mxu1 }
  0xe9   :  { %v674_v57 = vadd.f32 %v673_v56, %v672_v53  ;;  %v506_v58 = vadd.f32 %v505_v55, %v409_v54 }
  0xea   :  { %v675_v60 = vpop.f32.mrf.mxu0  ;;  %v508_v63 = vpop.f32.mrf.mxu1 }
  0xeb   :  { %v568_v61 = vmax.f32 %v506_v58, 0.0  ;;  %v412_v62 = vadd.f32 %v674_v57, %v988_v50 }
  0xec   :  { %v676_v0 = vpop.f32.mrf.mxu0  ;;  %v755_v4 = vpop.f32.mrf.mxu1 }
  0xed   :  { %584 = vst [vmem:[%s1057_s3] sm:$0xff] %v568_v61  ;;  %v677_v1 = vadd.f32 %v676_v0, %v675_v60  ;;  %v509_v2 = vadd.f32 %v508_v63, %v412_v62 }
  0xee   :  { %v678_v3 = vpop.f32.mrf.mxu0  ;;  %v521_v11 = vpop.f32.mrf.mxu1 }
  0xef   :  { %v417_v5 = vadd.f32 %v677_v1, %v988_v50  ;;  %v569_v6 = vmax.f32 %v509_v2, 0.0 }
  0xf0   :  { %v679_v7 = vpop.f32.mrf.mxu0  ;;  %v756_v18 = vpop.f32.mrf.mxu1 }
  0xf1   :  { %v514_v8 = vadd.f32 %v751_v52, %v417_v5  ;;  %585 = vst [vmem:[%s1057_s3 + $0x8] sm:$0xff] %v569_v6  ;;  %v680_v9 = vadd.f32 %v679_v7, %v678_v3 }
  0xf2   :  { %v681_v10 = vpop.f32.mrf.mxu0  ;;  %v524_v25 = vpop.f32.mrf.mxu1 }
  0xf3   :  { %v570_v12 = vmax.f32 %v514_v8, 0.0  ;;  %v420_v13 = vadd.f32 %v680_v9, %v988_v50 }
  0xf4   :  { %v682_v14 = vpop.f32.mrf.mxu0  ;;  %v759_v32 = vpop.f32.mrf.mxu1 }
  0xf5   :  { %586 = vst [vmem:[%s1057_s3 + $0x10] sm:$0xff] %v570_v12  ;;  %v517_v15 = vadd.f32 %v752_v59, %v420_v13  ;;  %v683_v16 = vadd.f32 %v682_v14, %v681_v10 }
  0xf6   :  { %v684_v17 = vpop.f32.mrf.mxu0  ;;  %v537_v39 = vpop.f32.mrf.mxu1 }
  0xf7   :  { %v571_v19 = vmax.f32 %v517_v15, 0.0  ;;  %v425_v20 = vadd.f32 %v683_v16, %v988_v50 }
  0xf8   :  { %v685_v21 = vpop.f32.mrf.mxu0  ;;  %v760_v46 = vpop.f32.mrf.mxu1 }
  0xf9   :  { %587 = vst [vmem:[%s1057_s3 + $0x18] sm:$0xff] %v571_v19  ;;  %v686_v22 = vadd.f32 %v685_v21, %v684_v17  ;;  %v522_v23 = vadd.f32 %v521_v11, %v425_v20 }
  0xfa   :  { %v687_v24 = vpop.f32.mrf.mxu0  ;;  %v540_v54 = vpop.f32.mrf.mxu1 }
  0xfb   :  { %v572_v26 = vmax.f32 %v522_v23, 0.0  ;;  %v428_v27 = vadd.f32 %v686_v22, %v988_v50 }
  0xfc   :  { %v688_v28 = vpop.f32.mrf.mxu0  ;;  %v763_v61 = vpop.f32.mrf.mxu1 }
  0xfd   :  { %588 = vst [vmem:[%s1057_s3 + $0x20] sm:$0xff] %v572_v26  ;;  %v689_v29 = vadd.f32 %v688_v28, %v687_v24  ;;  %v525_v30 = vadd.f32 %v524_v25, %v428_v27 }
  0xfe   :  { %v690_v31 = vpop.f32.mrf.mxu0 }
  0xff   :  { %v433_v33 = vadd.f32 %v689_v29, %v988_v50  ;;  %v573_v34 = vmax.f32 %v525_v30, 0.0 }
 0x100   :  { %v691_v35 = vpop.f32.mrf.mxu0 }
 0x101   :  { %v530_v36 = vadd.f32 %v755_v4, %v433_v33  ;;  %589 = vst [vmem:[%s1057_s3 + $0x28] sm:$0xff] %v573_v34  ;;  %v692_v37 = vadd.f32 %v691_v35, %v690_v31  ;;  %v553_v4 = vpop.f32.mrf.mxu1 }
 0x102   :  { %v693_v38 = vpop.f32.mrf.mxu0 }
 0x103   :  { %v574_v40 = vmax.f32 %v530_v36, 0.0  ;;  %v436_v41 = vadd.f32 %v692_v37, %v988_v50  ;;  %v764_v11 = vpop.f32.mrf.mxu1 }
 0x104   :  { %v694_v42 = vpop.f32.mrf.mxu0 }
 0x105   :  { %590 = vst [vmem:[%s1057_s3 + $0x30] sm:$0xff] %v574_v40  ;;  %v533_v43 = vadd.f32 %v756_v18, %v436_v41  ;;  %v695_v44 = vadd.f32 %v694_v42, %v693_v38  ;;  %v556_v18 = vpop.f32.mrf.mxu1 }
 0x106   :  { %v696_v45 = vpop.f32.mrf.mxu0 }
 0x107   :  { %v575_v47 = vmax.f32 %v533_v43, 0.0  ;;  %v441_v48 = vadd.f32 %v695_v44, %v988_v50 }
 0x108   :  { %v697_v49 = vpop.f32.mrf.mxu0 }
 0x109   :  { %591 = vst [vmem:[%s1057_s3 + $0x38] sm:$0xff] %v575_v47  ;;  %v698_v51 = vadd.f32 %v697_v49, %v696_v45  ;;  %v538_v52 = vadd.f32 %v537_v39, %v441_v48 }
 0x10a   :  { %v699_v53 = vpop.f32.mrf.mxu0 }
 0x10b   :  { %v576_v55 = vmax.f32 %v538_v52, 0.0  ;;  %v444_v56 = vadd.f32 %v698_v51, %v988_v50 }
 0x10c   :  { %v700_v57 = vpop.f32.mrf.mxu0 }
 0x10d   :  { %592 = vst [vmem:[%s1057_s3 + $0x40] sm:$0xff] %v576_v55  ;;  %v701_v58 = vadd.f32 %v700_v57, %v699_v53  ;;  %v541_v59 = vadd.f32 %v540_v54, %v444_v56 }
 0x10e   :  { %v702_v60 = vpop.f32.mrf.mxu0 }
 0x10f   :  { %v449_v62 = vadd.f32 %v701_v58, %v988_v50  ;;  %v577_v63 = vmax.f32 %v541_v59, 0.0 }
 0x110   :  { %v703_v0 = vpop.f32.mrf.mxu0 }
 0x111   :  { %v546_v1 = vadd.f32 %v759_v32, %v449_v62  ;;  %593 = vst [vmem:[%s1057_s3 + $0x48] sm:$0xff] %v577_v63  ;;  %v704_v2 = vadd.f32 %v703_v0, %v702_v60 }
 0x112   :  { %v705_v3 = vpop.f32.mrf.mxu0 }
 0x113   :  { %v578_v5 = vmax.f32 %v546_v1, 0.0  ;;  %v452_v6 = vadd.f32 %v704_v2, %v988_v50 }
 0x114   :  { %v706_v7 = vpop.f32.mrf.mxu0 }
 0x115   :  { %594 = vst [vmem:[%s1057_s3 + $0x50] sm:$0xff] %v578_v5  ;;  %v549_v8 = vadd.f32 %v760_v46, %v452_v6  ;;  %v707_v9 = vadd.f32 %v706_v7, %v705_v3 }
 0x116   :  { %v708_v10 = vpop.f32.mrf.mxu0 }
 0x117   :  { %v579_v12 = vmax.f32 %v549_v8, 0.0  ;;  %v457_v13 = vadd.f32 %v707_v9, %v988_v50 }
 0x118   :  { %v709_v14 = vpop.f32.mrf.mxu0 }
 0x119   :  { %595 = vst [vmem:[%s1057_s3 + $0x58] sm:$0xff] %v579_v12  ;;  %v710_v15 = vadd.f32 %v709_v14, %v708_v10  ;;  %v554_v16 = vadd.f32 %v553_v4, %v457_v13 }
 0x11a   :  { %v711_v17 = vpop.f32.mrf.mxu0 }
 0x11b   :  { %v580_v19 = vmax.f32 %v554_v16, 0.0  ;;  %v460_v20 = vadd.f32 %v710_v15, %v988_v50 }
 0x11c   :  { %v712_v21 = vpop.f32.mrf.mxu0 }
 0x11d   :  { %596 = vst [vmem:[%s1057_s3 + $0x60] sm:$0xff] %v580_v19  ;;  %v713_v22 = vadd.f32 %v712_v21, %v711_v17  ;;  %v557_v23 = vadd.f32 %v556_v18, %v460_v20 }
 0x11e   :  { %v714_v24 = vpop.f32.mrf.mxu0 }
 0x11f   :  { %v465_v25 = vadd.f32 %v713_v22, %v988_v50  ;;  %v581_v26 = vmax.f32 %v557_v23, 0.0 }
 0x120   :  { %v715_v27 = vpop.f32.mrf.mxu0 }
 0x121   :  { %v562_v28 = vadd.f32 %v763_v61, %v465_v25  ;;  %597 = vst [vmem:[%s1057_s3 + $0x68] sm:$0xff] %v581_v26  ;;  %v716_v29 = vadd.f32 %v715_v27, %v714_v24 }
 0x123   :  { %v582_v30 = vmax.f32 %v562_v28, 0.0  ;;  %v468_v31 = vadd.f32 %v716_v29, %v988_v50 }
 0x125   :  { %598 = vst [vmem:[%s1057_s3 + $0x70] sm:$0xff] %v582_v30  ;;  %v565_v32 = vadd.f32 %v764_v11, %v468_v31 }
 0x127   :  { %v583_v33 = vmax.f32 %v565_v32, 0.0 }
 0x129   :  { %599 = vst [vmem:[%s1057_s3 + $0x78] sm:$0xff] %v583_v33 }

// kernel: _lambda_.11
= control target key start
LH: loop header
LB: loop body
LE: loop exit
PB: predicated region body
PF: predicated region fallthrough
CT: control target
= control target key end

     0   :  { %v193_v0 = vmov 0.0   ;;  %vm194_vm0 = vmmov 0   ;;  %s251_s1 = inlined_call_operand.vmem [shape: bf16[128,128], index: 1, kind: input, shape index: {}]   ;;  %s252_s0 = inlined_call_operand.vmem [shape: bf16[16,128], index: 0, kind: input, shape index: {}]   ;;  %s253_s2 = inlined_call_operand.vmem [shape: f32[1,128], index: 2, kind: input, shape index: {}]   ;;  %s254_s3 = inlined_call_operand.vmem [shape: f32[16,128], index: 3, kind: output, shape index: {}]  }
   0x1   :  { %162 = vmatprep.subr.bf16.mxu0 %v193_v0  ;;  %v184_v1 = vld [vmem:[%s251_s1 + $0x38] sm:$0xff]   ;;  %178 = vmatprep.mubr.msk.bf16.mxu0 %vm194_vm0, %v193_v0  ;;  %v185_v2 = vld [vmem:[%s251_s1 + $0x30] sm:$0xff]   ;;  %v186_v3 = vld [vmem:[%s251_s1 + $0x28] sm:$0xff]  }
   0x2   :  { %163 = vmatpush3.bf16.msra.mxu0 %v184_v1  ;;  %v187_v4 = vld [vmem:[%s251_s1 + $0x20] sm:$0xff]   ;;  %v188_v5 = vld [vmem:[%s251_s1 + $0x18] sm:$0xff]   ;;  %v189_v6 = vld [vmem:[%s251_s1 + $0x10] sm:$0xff]  }
   0x3   :  { %164 = vmatprep.subr.bf16.mxu0 %v193_v0  ;;  %v190_v7 = vld [vmem:[%s251_s1 + $0x8] sm:$0xff]   ;;  %v191_v8 = vld [vmem:[%s251_s1] sm:$0xff]  }
   0x4   :  { %v192_v9 = vld [vmem:[%s252_s0] sm:$0xff]  }
   0x5   :  { %v143_v10 = vld [vmem:[%s253_s2] ss:$0 sm:$0xff] }
   0x6   :  { %165 = vmatpush3.bf16.msra.mxu0 %v185_v2 }
   0x7   :  { %166 = vmatprep.subr.bf16.mxu0 %v193_v0 }
   0xa   :  { %167 = vmatpush3.bf16.msra.mxu0 %v186_v3 }
   0xb   :  { %168 = vmatprep.subr.bf16.mxu0 %v193_v0 }
   0xe   :  { %169 = vmatpush3.bf16.msra.mxu0 %v187_v4 }
   0xf   :  { %170 = vmatprep.subr.bf16.mxu0 %v193_v0 }
  0x12   :  { %171 = vmatpush3.bf16.msra.mxu0 %v188_v5 }
  0x13   :  { %172 = vmatprep.subr.bf16.mxu0 %v193_v0 }
  0x16   :  { %173 = vmatpush3.bf16.msra.mxu0 %v189_v6 }
  0x17   :  { %174 = vmatprep.subr.bf16.mxu0 %v193_v0 }
  0x1a   :  { %175 = vmatpush3.bf16.msra.mxu0 %v190_v7 }
  0x1b   :  { %176 = vmatprep.subr.bf16.mxu0 %v193_v0 }
  0x1e   :  { %177 = vmatpush3.bf16.msra.mxu0 %v191_v8 }
  0x21   :  { %179 = vmatmul.mubr.bf16.vlgmr.msra.gmra.mxu0 %v192_v9 }
  0xe1   :  { %v128_v11 = vpop.f32.mrf.mxu0 }
  0xe2   :  { %v129_v12 = vadd.f32 %v143_v10, %v128_v11 }
  0xe3   :  { %v180_v13 = vpop.f32.mrf.mxu0 }
  0xe4   :  { %v135_v14 = vmax.f32 %v129_v12, 0.0 }
  0xe5   :  { %v131_v15 = vpop.f32.mrf.mxu0 }
  0xe6   :  { %137 = vst [vmem:[%s254_s3] sm:$0xff] %v135_v14  ;;  %v132_v16 = vadd.f32 %v143_v10, %v131_v15 }
  0xe7   :  { %v181_v17 = vpop.f32.mrf.mxu0 }
  0xe8   :  { %v136_v18 = vmax.f32 %v132_v16, 0.0 }
  0xea   :  { %138 = vst [vmem:[%s254_s3 + $0x8] sm:$0xff] %v136_v18 }

// kernel: _lambda_.15
= control target key start
LH: loop header
LB: loop body
LE: loop exit
PB: predicated region body
PF: predicated region fallthrough
CT: control target
= control target key end

     0   :  { %s499_s1 = inlined_call_operand.vmem [shape: bf16[128,128], index: 1, kind: input, shape index: {}]   ;;  %s500_s0 = inlined_call_operand.vmem [shape: bf16[128,128], index: 0, kind: input, shape index: {}]   ;;  %s501_s2 = inlined_call_operand.vmem [shape: f32[1,128], index: 2, kind: input, shape index: {}]   ;;  %s502_s3 = inlined_call_operand.vmem [shape: f32[128,128], index: 3, kind: output, shape index: {}]  }
   0x1   :  { %v364_v0 = vld [vmem:[%s499_s1 + $0x38] sm:$0xff]   ;;  %v365_v1 = vld [vmem:[%s499_s1 + $0x30] sm:$0xff]   ;;  %v366_v2 = vld [vmem:[%s499_s1 + $0x28] sm:$0xff]  }
   0x2   :  { %316 = vmatprep.subr.bf16.mxu0 %v364_v0  ;;  %348 = vmatprep.subr.bf16.mxu1 %v364_v0  ;;  %v367_v3 = vld [vmem:[%s499_s1 + $0x20] sm:$0xff]   ;;  %v368_v6 = vld [vmem:[%s499_s1 + $0x18] sm:$0xff]   ;;  %v369_v7 = vld [vmem:[%s499_s1 + $0x10] sm:$0xff]  }
   0x3   :  { %317 = vmatpush3.bf16.msra.mxu0 %v364_v0  ;;  %356 = vmatpush3.bf16.msra.mxu1 %v364_v0  ;;  %v372_v4 = vld [vmem:[%s500_s0] sm:$0xff]   ;;  %v370_v8 = vld [vmem:[%s499_s1 + $0x8] sm:$0xff]   ;;  %v376_v12 = vld [vmem:[%s500_s0 + $0x10] sm:$0xff]  }
   0x4   :  { %318 = vmatprep.subr.bf16.mxu0 %v365_v1  ;;  %349 = vmatprep.subr.bf16.mxu1 %v365_v1  ;;  %v373_v5 = vld [vmem:[%s500_s0 + $0x20] sm:$0xff]   ;;  %v374_v10 = vld [vmem:[%s500_s0 + $0x8] sm:$0xff]   ;;  %v377_v13 = vld [vmem:[%s500_s0 + $0x30] sm:$0xff]  }
   0x5   :  { %332 = vmatprep.mubr.bf16.mxu0 %v372_v4  ;;  %340 = vmatprep.mubr.bf16.mxu1 %v373_v5  ;;  %v371_v9 = vld [vmem:[%s499_s1] sm:$0xff]   ;;  %v375_v11 = vld [vmem:[%s500_s0 + $0x28] sm:$0xff]   ;;  %v378_v14 = vld [vmem:[%s500_s0 + $0x18] sm:$0xff]  }
   0x6   :  { %v379_v15 = vld [vmem:[%s500_s0 + $0x38] sm:$0xff]   ;;  %v283_v16 = vld [vmem:[%s501_s2] ss:$0 sm:$0xff] }
   0x7   :  { %319 = vmatpush3.bf16.msra.mxu0 %v365_v1  ;;  %357 = vmatpush3.bf16.msra.mxu1 %v365_v1 }
   0x8   :  { %320 = vmatprep.subr.bf16.mxu0 %v366_v2  ;;  %350 = vmatprep.subr.bf16.mxu1 %v366_v2 }
   0xb   :  { %321 = vmatpush3.bf16.msra.mxu0 %v366_v2  ;;  %358 = vmatpush3.bf16.msra.mxu1 %v366_v2 }
   0xc   :  { %322 = vmatprep.subr.bf16.mxu0 %v367_v3  ;;  %351 = vmatprep.subr.bf16.mxu1 %v367_v3 }
   0xf   :  { %323 = vmatpush3.bf16.msra.mxu0 %v367_v3  ;;  %359 = vmatpush3.bf16.msra.mxu1 %v367_v3 }
  0x10   :  { %324 = vmatprep.subr.bf16.mxu0 %v368_v6  ;;  %352 = vmatprep.subr.bf16.mxu1 %v368_v6 }
  0x13   :  { %325 = vmatpush3.bf16.msra.mxu0 %v368_v6  ;;  %360 = vmatpush3.bf16.msra.mxu1 %v368_v6 }
  0x14   :  { %326 = vmatprep.subr.bf16.mxu0 %v369_v7  ;;  %353 = vmatprep.subr.bf16.mxu1 %v369_v7 }
  0x17   :  { %327 = vmatpush3.bf16.msra.mxu0 %v369_v7  ;;  %361 = vmatpush3.bf16.msra.mxu1 %v369_v7 }
  0x18   :  { %328 = vmatprep.subr.bf16.mxu0 %v370_v8  ;;  %354 = vmatprep.subr.bf16.mxu1 %v370_v8 }
  0x1b   :  { %329 = vmatpush3.bf16.msra.mxu0 %v370_v8  ;;  %362 = vmatpush3.bf16.msra.mxu1 %v370_v8 }
  0x1c   :  { %330 = vmatprep.subr.bf16.mxu0 %v371_v9  ;;  %355 = vmatprep.subr.bf16.mxu1 %v371_v9 }
  0x1f   :  { %331 = vmatpush3.bf16.msra.mxu0 %v371_v9  ;;  %363 = vmatpush3.bf16.msra.mxu1 %v371_v9 }
  0x22   :  { %333 = vmatmul.mubr.bf16.vlgmr.msra.gmra.mxu0 %v374_v10  ;;  %341 = vmatmul.mubr.bf16.vlgmr.msra.gmra.mxu1 %v375_v11 }
  0x23   :  { %336 = vmatprep.mubr.bf16.mxu0 %v376_v12  ;;  %344 = vmatprep.mubr.bf16.mxu1 %v377_v13 }
  0x2a   :  { %337 = vmatmul.mubr.bf16.gmra.mxu0 %v378_v14  ;;  %345 = vmatmul.mubr.bf16.gmra.mxu1 %v379_v15 }
  0xe2   :  { %v334_v17 = vpop.f32.mrf.mxu0  ;;  %v342_v18 = vpop.f32.mrf.mxu1 }
  0xe3   :  { %v193_v19 = vadd.f32 %v334_v17, %v283_v16  ;;  %v225_v20 = vadd.f32 %v342_v18, %v283_v16 }
  0xe4   :  { %v184_v21 = vpop.f32.mrf.mxu0  ;;  %v216_v22 = vpop.f32.mrf.mxu1 }
  0xe5   :  { %v249_v23 = vmax.f32 %v193_v19, 0.0  ;;  %v257_v24 = vmax.f32 %v225_v20, 0.0  ;;  %v185_v25 = vadd.f32 %v283_v16, %v184_v21  ;;  %v217_v26 = vadd.f32 %v283_v16, %v216_v22 }
  0xe6   :  { %v335_v27 = vpop.f32.mrf.mxu0  ;;  %v343_v28 = vpop.f32.mrf.mxu1 }
  0xe7   :  { %265 = vst [vmem:[%s502_s3 + $0x10] sm:$0xff] %v249_v23  ;;  %273 = vst [vmem:[%s502_s3 + $0x50] sm:$0xff] %v257_v24  ;;  %v247_v29 = vmax.f32 %v185_v25, 0.0  ;;  %v255_v30 = vmax.f32 %v217_v26, 0.0  ;;  %v196_v31 = vadd.f32 %v335_v27, %v283_v16  ;;  %v228_v32 = vadd.f32 %v343_v28, %v283_v16 }
  0xe8   :  { %v187_v33 = vpop.f32.mrf.mxu0  ;;  %v219_v34 = vpop.f32.mrf.mxu1 }
  0xe9   :  { %263 = vst [vmem:[%s502_s3] sm:$0xff] %v247_v29  ;;  %271 = vst [vmem:[%s502_s3 + $0x40] sm:$0xff] %v255_v30  ;;  %v250_v35 = vmax.f32 %v196_v31, 0.0  ;;  %v258_v36 = vmax.f32 %v228_v32, 0.0  ;;  %v188_v37 = vadd.f32 %v283_v16, %v187_v33  ;;  %v220_v38 = vadd.f32 %v283_v16, %v219_v34 }
  0xea   :  { %v338_v39 = vpop.f32.mrf.mxu0  ;;  %v346_v40 = vpop.f32.mrf.mxu1 }
  0xeb   :  { %266 = vst [vmem:[%s502_s3 + $0x18] sm:$0xff] %v250_v35  ;;  %274 = vst [vmem:[%s502_s3 + $0x58] sm:$0xff] %v258_v36  ;;  %v248_v41 = vmax.f32 %v188_v37, 0.0  ;;  %v256_v42 = vmax.f32 %v220_v38, 0.0  ;;  %v209_v43 = vadd.f32 %v338_v39, %v283_v16  ;;  %v241_v44 = vadd.f32 %v346_v40, %v283_v16 }
  0xec   :  { %v200_v45 = vpop.f32.mrf.mxu0  ;;  %v232_v46 = vpop.f32.mrf.mxu1 }
  0xed   :  { %264 = vst [vmem:[%s502_s3 + $0x8] sm:$0xff] %v248_v41  ;;  %272 = vst [vmem:[%s502_s3 + $0x48] sm:$0xff] %v256_v42  ;;  %v253_v47 = vmax.f32 %v209_v43, 0.0  ;;  %v261_v48 = vmax.f32 %v241_v44, 0.0  ;;  %v201_v49 = vadd.f32 %v283_v16, %v200_v45  ;;  %v233_v50 = vadd.f32 %v283_v16, %v232_v46 }
  0xee   :  { %v339_v51 = vpop.f32.mrf.mxu0  ;;  %v347_v52 = vpop.f32.mrf.mxu1 }
  0xef   :  { %269 = vst [vmem:[%s502_s3 + $0x30] sm:$0xff] %v253_v47  ;;  %277 = vst [vmem:[%s502_s3 + $0x70] sm:$0xff] %v261_v48  ;;  %v251_v53 = vmax.f32 %v201_v49, 0.0  ;;  %v259_v54 = vmax.f32 %v233_v50, 0.0  ;;  %v212_v55 = vadd.f32 %v339_v51, %v283_v16  ;;  %v244_v56 = vadd.f32 %v347_v52, %v283_v16 }
  0xf0   :  { %v203_v57 = vpop.f32.mrf.mxu0  ;;  %v235_v58 = vpop.f32.mrf.mxu1 }
  0xf1   :  { %267 = vst [vmem:[%s502_s3 + $0x20] sm:$0xff] %v251_v53  ;;  %275 = vst [vmem:[%s502_s3 + $0x60] sm:$0xff] %v259_v54  ;;  %v254_v59 = vmax.f32 %v212_v55, 0.0  ;;  %v262_v60 = vmax.f32 %v244_v56, 0.0  ;;  %v204_v61 = vadd.f32 %v283_v16, %v203_v57  ;;  %v236_v62 = vadd.f32 %v283_v16, %v235_v58 }
  0xf3   :  { %270 = vst [vmem:[%s502_s3 + $0x38] sm:$0xff] %v254_v59  ;;  %278 = vst [vmem:[%s502_s3 + $0x78] sm:$0xff] %v262_v60  ;;  %v252_v63 = vmax.f32 %v204_v61, 0.0  ;;  %v260_v0 = vmax.f32 %v236_v62, 0.0 }
  0xf5   :  { %268 = vst [vmem:[%s502_s3 + $0x28] sm:$0xff] %v252_v63  ;;  %276 = vst [vmem:[%s502_s3 + $0x68] sm:$0xff] %v260_v0 }

// kernel: _lambda_.16
= control target key start
LH: loop header
LB: loop body
LE: loop exit
PB: predicated region body
PF: predicated region fallthrough
CT: control target
= control target key end

     0   :  { %s805_s1 = inlined_call_operand.vmem [shape: bf16[128,128], index: 1, kind: input, shape index: {}]   ;;  %s806_s0 = inlined_call_operand.vmem [shape: bf16[256,128], index: 0, kind: input, shape index: {}]   ;;  %s807_s2 = inlined_call_operand.vmem [shape: f32[1,128], index: 2, kind: input, shape index: {}]   ;;  %s808_s3 = inlined_call_operand.vmem [shape: f32[256,128], index: 3, kind: output, shape index: {}]  }
   0x1   :  { %v556_v0 = vld [vmem:[%s805_s1 + $0x38] sm:$0xff]   ;;  %v557_v1 = vld [vmem:[%s805_s1 + $0x30] sm:$0xff]   ;;  %v558_v2 = vld [vmem:[%s805_s1 + $0x28] sm:$0xff]  }
   0x2   :  { %492 = vmatprep.subr.bf16.mxu0 %v556_v0  ;;  %540 = vmatprep.subr.bf16.mxu1 %v556_v0  ;;  %v559_v3 = vld [vmem:[%s805_s1 + $0x20] sm:$0xff]   ;;  %v560_v6 = vld [vmem:[%s805_s1 + $0x18] sm:$0xff]   ;;  %v561_v7 = vld [vmem:[%s805_s1 + $0x10] sm:$0xff]  }
   0x3   :  { %493 = vmatpush3.bf16.msra.mxu0 %v556_v0  ;;  %548 = vmatpush3.bf16.msra.mxu1 %v556_v0  ;;  %v564_v4 = vld [vmem:[%s806_s0] sm:$0xff]   ;;  %v562_v8 = vld [vmem:[%s805_s1 + $0x8] sm:$0xff]   ;;  %v568_v12 = vld [vmem:[%s806_s0 + $0x10] sm:$0xff]  }
   0x4   :  { %494 = vmatprep.subr.bf16.mxu0 %v557_v1  ;;  %541 = vmatprep.subr.bf16.mxu1 %v557_v1  ;;  %v565_v5 = vld [vmem:[%s806_s0 + $0x40] sm:$0xff]   ;;  %v566_v10 = vld [vmem:[%s806_s0 + $0x8] sm:$0xff]   ;;  %v569_v13 = vld [vmem:[%s806_s0 + $0x50] sm:$0xff]  }
   0x5   :  { %508 = vmatprep.mubr.bf16.mxu0 %v564_v4  ;;  %524 = vmatprep.mubr.bf16.mxu1 %v565_v5  ;;  %v563_v9 = vld [vmem:[%s805_s1] sm:$0xff]   ;;  %v567_v11 = vld [vmem:[%s806_s0 + $0x48] sm:$0xff]   ;;  %v570_v14 = vld [vmem:[%s806_s0 + $0x18] sm:$0xff]  }
   0x6   :  { %v571_v15 = vld [vmem:[%s806_s0 + $0x58] sm:$0xff]   ;;  %v572_v16 = vld [vmem:[%s806_s0 + $0x20] sm:$0xff]   ;;  %v574_v18 = vld [vmem:[%s806_s0 + $0x28] sm:$0xff]  }
   0x7   :  { %495 = vmatpush3.bf16.msra.mxu0 %v557_v1  ;;  %549 = vmatpush3.bf16.msra.mxu1 %v557_v1  ;;  %v573_v17 = vld [vmem:[%s806_s0 + $0x60] sm:$0xff]   ;;  %v575_v19 = vld [vmem:[%s806_s0 + $0x68] sm:$0xff]   ;;  %v576_v20 = vld [vmem:[%s806_s0 + $0x30] sm:$0xff]  }
   0x8   :  { %496 = vmatprep.subr.bf16.mxu0 %v558_v2  ;;  %542 = vmatprep.subr.bf16.mxu1 %v558_v2  ;;  %v577_v21 = vld [vmem:[%s806_s0 + $0x70] sm:$0xff]   ;;  %v578_v22 = vld [vmem:[%s806_s0 + $0x38] sm:$0xff]   ;;  %v675_v24 = vld [vmem:[%s807_s2] ss:$0 sm:$0xff] }
   0x9   :  { %v579_v23 = vld [vmem:[%s806_s0 + $0x78] sm:$0xff]  }
   0xb   :  { %497 = vmatpush3.bf16.msra.mxu0 %v558_v2  ;;  %550 = vmatpush3.bf16.msra.mxu1 %v558_v2 }
   0xc   :  { %498 = vmatprep.subr.bf16.mxu0 %v559_v3  ;;  %543 = vmatprep.subr.bf16.mxu1 %v559_v3 }
   0xf   :  { %499 = vmatpush3.bf16.msra.mxu0 %v559_v3  ;;  %551 = vmatpush3.bf16.msra.mxu1 %v559_v3 }
  0x10   :  { %500 = vmatprep.subr.bf16.mxu0 %v560_v6  ;;  %544 = vmatprep.subr.bf16.mxu1 %v560_v6 }
  0x13   :  { %501 = vmatpush3.bf16.msra.mxu0 %v560_v6  ;;  %552 = vmatpush3.bf16.msra.mxu1 %v560_v6 }
  0x14   :  { %502 = vmatprep.subr.bf16.mxu0 %v561_v7  ;;  %545 = vmatprep.subr.bf16.mxu1 %v561_v7 }
  0x17   :  { %503 = vmatpush3.bf16.msra.mxu0 %v561_v7  ;;  %553 = vmatpush3.bf16.msra.mxu1 %v561_v7 }
  0x18   :  { %504 = vmatprep.subr.bf16.mxu0 %v562_v8  ;;  %546 = vmatprep.subr.bf16.mxu1 %v562_v8 }
  0x1b   :  { %505 = vmatpush3.bf16.msra.mxu0 %v562_v8  ;;  %554 = vmatpush3.bf16.msra.mxu1 %v562_v8 }
  0x1c   :  { %506 = vmatprep.subr.bf16.mxu0 %v563_v9  ;;  %547 = vmatprep.subr.bf16.mxu1 %v563_v9 }
  0x1f   :  { %507 = vmatpush3.bf16.msra.mxu0 %v563_v9  ;;  %555 = vmatpush3.bf16.msra.mxu1 %v563_v9 }
  0x22   :  { %509 = vmatmul.mubr.bf16.vlgmr.msra.gmra.mxu0 %v566_v10  ;;  %525 = vmatmul.mubr.bf16.vlgmr.msra.gmra.mxu1 %v567_v11 }
  0x23   :  { %512 = vmatprep.mubr.bf16.mxu0 %v568_v12  ;;  %528 = vmatprep.mubr.bf16.mxu1 %v569_v13 }
  0x2a   :  { %513 = vmatmul.mubr.bf16.gmra.mxu0 %v570_v14  ;;  %529 = vmatmul.mubr.bf16.gmra.mxu1 %v571_v15 }
  0x2b   :  { %516 = vmatprep.mubr.bf16.mxu0 %v572_v16  ;;  %532 = vmatprep.mubr.bf16.mxu1 %v573_v17 }
  0x32   :  { %517 = vmatmul.mubr.bf16.gmra.mxu0 %v574_v18  ;;  %533 = vmatmul.mubr.bf16.gmra.mxu1 %v575_v19 }
  0x33   :  { %520 = vmatprep.mubr.bf16.mxu0 %v576_v20  ;;  %536 = vmatprep.mubr.bf16.mxu1 %v577_v21 }
  0x3a   :  { %521 = vmatmul.mubr.bf16.gmra.mxu0 %v578_v22  ;;  %537 = vmatmul.mubr.bf16.gmra.mxu1 %v579_v23 }
  0xe2   :  { %v510_v25 = vpop.f32.mrf.mxu0  ;;  %v526_v26 = vpop.f32.mrf.mxu1 }
  0xe3   :  { %v257_v27 = vadd.f32 %v510_v25, %v675_v24  ;;  %v321_v28 = vadd.f32 %v526_v26, %v675_v24 }
  0xe4   :  { %v248_v29 = vpop.f32.mrf.mxu0  ;;  %v312_v30 = vpop.f32.mrf.mxu1 }
  0xe5   :  { %v377_v31 = vmax.f32 %v257_v27, 0.0  ;;  %v393_v32 = vmax.f32 %v321_v28, 0.0  ;;  %v249_v33 = vadd.f32 %v675_v24, %v248_v29  ;;  %v313_v34 = vadd.f32 %v675_v24, %v312_v30 }
  0xe6   :  { %v511_v35 = vpop.f32.mrf.mxu0  ;;  %v527_v36 = vpop.f32.mrf.mxu1 }
  0xe7   :  { %409 = vst [vmem:[%s808_s3 + $0x10] sm:$0xff] %v377_v31  ;;  %425 = vst [vmem:[%s808_s3 + $0x90] sm:$0xff] %v393_v32  ;;  %v375_v37 = vmax.f32 %v249_v33, 0.0  ;;  %v391_v38 = vmax.f32 %v313_v34, 0.0  ;;  %v260_v39 = vadd.f32 %v511_v35, %v675_v24  ;;  %v324_v40 = vadd.f32 %v527_v36, %v675_v24 }
  0xe8   :  { %v251_v41 = vpop.f32.mrf.mxu0  ;;  %v315_v42 = vpop.f32.mrf.mxu1 }
  0xe9   :  { %407 = vst [vmem:[%s808_s3] sm:$0xff] %v375_v37  ;;  %423 = vst [vmem:[%s808_s3 + $0x80] sm:$0xff] %v391_v38  ;;  %v378_v43 = vmax.f32 %v260_v39, 0.0  ;;  %v394_v44 = vmax.f32 %v324_v40, 0.0  ;;  %v252_v45 = vadd.f32 %v675_v24, %v251_v41  ;;  %v316_v46 = vadd.f32 %v675_v24, %v315_v42 }
  0xea   :  { %v514_v47 = vpop.f32.mrf.mxu0  ;;  %v530_v48 = vpop.f32.mrf.mxu1 }
  0xeb   :  { %410 = vst [vmem:[%s808_s3 + $0x18] sm:$0xff] %v378_v43  ;;  %426 = vst [vmem:[%s808_s3 + $0x98] sm:$0xff] %v394_v44  ;;  %v376_v49 = vmax.f32 %v252_v45, 0.0  ;;  %v392_v50 = vmax.f32 %v316_v46, 0.0  ;;  %v273_v51 = vadd.f32 %v514_v47, %v675_v24  ;;  %v337_v52 = vadd.f32 %v530_v48, %v675_v24 }
  0xec   :  { %v264_v53 = vpop.f32.mrf.mxu0  ;;  %v328_v54 = vpop.f32.mrf.mxu1 }
  0xed   :  { %408 = vst [vmem:[%s808_s3 + $0x8] sm:$0xff] %v376_v49  ;;  %424 = vst [vmem:[%s808_s3 + $0x88] sm:$0xff] %v392_v50  ;;  %v381_v55 = vmax.f32 %v273_v51, 0.0  ;;  %v397_v56 = vmax.f32 %v337_v52, 0.0  ;;  %v265_v57 = vadd.f32 %v675_v24, %v264_v53  ;;  %v329_v58 = vadd.f32 %v675_v24, %v328_v54 }
  0xee   :  { %v515_v59 = vpop.f32.mrf.mxu0  ;;  %v531_v60 = vpop.f32.mrf.mxu1 }
  0xef   :  { %413 = vst [vmem:[%s808_s3 + $0x30] sm:$0xff] %v381_v55  ;;  %429 = vst [vmem:[%s808_s3 + $0xb0] sm:$0xff] %v397_v56  ;;  %v379_v61 = vmax.f32 %v265_v57, 0.0  ;;  %v395_v62 = vmax.f32 %v329_v58, 0.0  ;;  %v276_v63 = vadd.f32 %v515_v59, %v675_v24  ;;  %v340_v0 = vadd.f32 %v531_v60, %v675_v24 }
  0xf0   :  { %v267_v1 = vpop.f32.mrf.mxu0  ;;  %v331_v2 = vpop.f32.mrf.mxu1 }
  0xf1   :  { %411 = vst [vmem:[%s808_s3 + $0x20] sm:$0xff] %v379_v61  ;;  %427 = vst [vmem:[%s808_s3 + $0xa0] sm:$0xff] %v395_v62  ;;  %v382_v3 = vmax.f32 %v276_v63, 0.0  ;;  %v398_v4 = vmax.f32 %v340_v0, 0.0  ;;  %v268_v5 = vadd.f32 %v675_v24, %v267_v1  ;;  %v332_v6 = vadd.f32 %v675_v24, %v331_v2 }
  0xf2   :  { %v518_v7 = vpop.f32.mrf.mxu0  ;;  %v534_v8 = vpop.f32.mrf.mxu1 }
  0xf3   :  { %414 = vst [vmem:[%s808_s3 + $0x38] sm:$0xff] %v382_v3  ;;  %430 = vst [vmem:[%s808_s3 + $0xb8] sm:$0xff] %v398_v4  ;;  %v380_v9 = vmax.f32 %v268_v5, 0.0  ;;  %v396_v10 = vmax.f32 %v332_v6, 0.0  ;;  %v289_v11 = vadd.f32 %v518_v7, %v675_v24  ;;  %v353_v12 = vadd.f32 %v534_v8, %v675_v24 }
  0xf4   :  { %v280_v13 = vpop.f32.mrf.mxu0  ;;  %v344_v14 = vpop.f32.mrf.mxu1 }
  0xf5   :  { %412 = vst [vmem:[%s808_s3 + $0x28] sm:$0xff] %v380_v9  ;;  %428 = vst [vmem:[%s808_s3 + $0xa8] sm:$0xff] %v396_v10  ;;  %v385_v15 = vmax.f32 %v289_v11, 0.0  ;;  %v401_v16 = vmax.f32 %v353_v12, 0.0  ;;  %v281_v17 = vadd.f32 %v675_v24, %v280_v13  ;;  %v345_v18 = vadd.f32 %v675_v24, %v344_v14 }
  0xf6   :  { %v519_v19 = vpop.f32.mrf.mxu0  ;;  %v535_v20 = vpop.f32.mrf.mxu1 }
  0xf7   :  { %417 = vst [vmem:[%s808_s3 + $0x50] sm:$0xff] %v385_v15  ;;  %433 = vst [vmem:[%s808_s3 + $0xd0] sm:$0xff] %v401_v16  ;;  %v383_v21 = vmax.f32 %v281_v17, 0.0  ;;  %v399_v22 = vmax.f32 %v345_v18, 0.0  ;;  %v292_v23 = vadd.f32 %v519_v19, %v675_v24  ;;  %v356_v25 = vadd.f32 %v535_v20, %v675_v24 }
  0xf8   :  { %v283_v26 = vpop.f32.mrf.mxu0  ;;  %v347_v27 = vpop.f32.mrf.mxu1 }
  0xf9   :  { %415 = vst [vmem:[%s808_s3 + $0x40] sm:$0xff] %v383_v21  ;;  %431 = vst [vmem:[%s808_s3 + $0xc0] sm:$0xff] %v399_v22  ;;  %v386_v28 = vmax.f32 %v292_v23, 0.0  ;;  %v402_v29 = vmax.f32 %v356_v25, 0.0  ;;  %v284_v30 = vadd.f32 %v675_v24, %v283_v26  ;;  %v348_v31 = vadd.f32 %v675_v24, %v347_v27 }
  0xfa   :  { %v522_v32 = vpop.f32.mrf.mxu0  ;;  %v538_v33 = vpop.f32.mrf.mxu1 }
  0xfb   :  { %418 = vst [vmem:[%s808_s3 + $0x58] sm:$0xff] %v386_v28  ;;  %434 = vst [vmem:[%s808_s3 + $0xd8] sm:$0xff] %v402_v29  ;;  %v384_v34 = vmax.f32 %v284_v30, 0.0  ;;  %v400_v35 = vmax.f32 %v348_v31, 0.0  ;;  %v305_v36 = vadd.f32 %v522_v32, %v675_v24  ;;  %v369_v37 = vadd.f32 %v538_v33, %v675_v24 }
  0xfc   :  { %v296_v38 = vpop.f32.mrf.mxu0  ;;  %v360_v39 = vpop.f32.mrf.mxu1 }
  0xfd   :  { %416 = vst [vmem:[%s808_s3 + $0x48] sm:$0xff] %v384_v34  ;;  %432 = vst [vmem:[%s808_s3 + $0xc8] sm:$0xff] %v400_v35  ;;  %v389_v40 = vmax.f32 %v305_v36, 0.0  ;;  %v405_v41 = vmax.f32 %v369_v37, 0.0  ;;  %v297_v42 = vadd.f32 %v675_v24, %v296_v38  ;;  %v361_v43 = vadd.f32 %v675_v24, %v360_v39 }
  0xfe   :  { %v523_v44 = vpop.f32.mrf.mxu0  ;;  %v539_v45 = vpop.f32.mrf.mxu1 }
  0xff   :  { %421 = vst [vmem:[%s808_s3 + $0x70] sm:$0xff] %v389_v40  ;;  %437 = vst [vmem:[%s808_s3 + $0xf0] sm:$0xff] %v405_v41  ;;  %v387_v46 = vmax.f32 %v297_v42, 0.0  ;;  %v403_v47 = vmax.f32 %v361_v43, 0.0  ;;  %v308_v48 = vadd.f32 %v523_v44, %v675_v24  ;;  %v372_v49 = vadd.f32 %v539_v45, %v675_v24 }
 0x100   :  { %v299_v50 = vpop.f32.mrf.mxu0  ;;  %v363_v51 = vpop.f32.mrf.mxu1 }
 0x101   :  { %419 = vst [vmem:[%s808_s3 + $0x60] sm:$0xff] %v387_v46  ;;  %435 = vst [vmem:[%s808_s3 + $0xe0] sm:$0xff] %v403_v47  ;;  %v390_v52 = vmax.f32 %v308_v48, 0.0  ;;  %v406_v53 = vmax.f32 %v372_v49, 0.0  ;;  %v300_v54 = vadd.f32 %v675_v24, %v299_v50  ;;  %v364_v55 = vadd.f32 %v675_v24, %v363_v51 }
 0x103   :  { %422 = vst [vmem:[%s808_s3 + $0x78] sm:$0xff] %v390_v52  ;;  %438 = vst [vmem:[%s808_s3 + $0xf8] sm:$0xff] %v406_v53  ;;  %v388_v56 = vmax.f32 %v300_v54, 0.0  ;;  %v404_v57 = vmax.f32 %v364_v55, 0.0 }
 0x105   :  { %420 = vst [vmem:[%s808_s3 + $0x68] sm:$0xff] %v388_v56  ;;  %436 = vst [vmem:[%s808_s3 + $0xe8] sm:$0xff] %v404_v57 }

// kernel: _lambda_.17
= control target key start
LH: loop header
LB: loop body
LE: loop exit
PB: predicated region body
PF: predicated region fallthrough
CT: control target
= control target key end

     0   :  { %12 = vsyncpa [#allocation3], 0  ;;  %s1246_s0 = inlined_call_operand.vmem [shape: f32[8,32], index: 0, kind: input, shape index: {}]   ;;  %s1247_s1 = inlined_call_operand.vmem [shape: f32[32,32], index: 1, kind: input, shape index: {}]   ;;  %s1248_s2 = inlined_call_operand.vmem [shape: f32[1,32], index: 2, kind: input, shape index: {}]   ;;  %s1249_s3 = inlined_call_operand.vmem [shape: f32[2,128,32], index: 3, kind: input, shape index: {}]   ;;  %s1250_s4 = inlined_call_operand.vmem [shape: f32[2,128,32], index: 4, kind: input, shape index: {}]   ;;  %s1251_s5 = inlined_call_operand.hbm [shape: f32[2,8,32], index: 5, kind: output, shape index: {0}]   ;;  %s1252_s6 = inlined_call_operand.vmem [shape: f32[2,8,128], index: 6, kind: output, shape index: {1}]  }
   0x1   :  { %14 = vsyncpa [#allocation3 + $0x1], 0  ;;  %s1018_s21 = smov 0   ;;  %s1020_s22 = smov 0  }
   0x2   :  { %s1022_s23 = smov 0   ;;  %s1024_s24 = smov 0  }
   0x3 LB: > { %s1039_s25 = sadd.s32 4294967295, %s978_s24   ;;  %s718_s26 = sadd.s32 4294967294, %s978_s24   ;;  %s978_s24 = sphi %s1024_s24, %s1258_s24   ;;  %s974_s23 = sphi %s1022_s23, %s1257_s23   ;;  %s970_s22 = sphi %s1020_s22, %s1256_s22   ;;  %s966_s21 = sphi %s1018_s21, %s1255_s21  }
   0x4   : > { %s1043_s27 = sadd.s32 1, %s978_s24   ;;  %s142_s28 = sadd.s32 1, %s974_s23 }
   0x5   : > { %s139_s29 = ssub.s32 %s978_s24, %s1043_s27  ;;  %p152_p0 = scmp.ne.s32.totalorder %s974_s23, %s970_s22 }
   0x6   : > { %p140_p1 = scmp.eq.s32.totalorder %s139_s29, 0  ;;  %p153_p2 = scmp.eq.s32.totalorder %s1039_s25, 1 }
   0x7   : > { %p158_p3 = scmp.ne.s32.totalorder %s970_s22, %s966_s21  ;;  %p159_p4 = scmp.eq.s32.totalorder %s718_s26, 1 }
   0x8   : > { %s1054_s30 = scalar_select %p140_p1, %s974_s23, %s142_s28  }
   0x9   : > { %p1056_p5 = por %p153_p2, %p152_p0  ;;  %p1060_p6 = por %p159_p4, %p158_p3 }
   0xa   : > { %p721_p7 = scmp.ge.s32.totalorder %s978_s24, 1  ;;  %p228_p8 = scmp.lt.s32.totalorder %s978_s24, 3 }
   0xc   : > { %p229_p9 = pnand %p721_p7, %p228_p8 }
   0xd   : > { %p267_p10 = scmp.lt.s32.totalorder (!%p229_p9), %s1039_s25, 1  ;;  %s258_s19 = sand.u32 (!%p229_p9), 1, %s970_s22  }
   0xe   : > { %232 = sbr.rel (%p229_p9) target bundleno = 935 (0x3a7), region = 40  ;;  %s722_s20 = sshll.u32 (!%p229_p9), %s258_s19, 3 }
   0xf   : > { %s748_s26 = sshll.u32 (!%p229_p9), %s1039_s25, 7  ;;  %s260_s28 = scalar_lea.vmem (!%p229_p9), [#allocation2], %s722_s20 }
  0x10   : > { %s1204_s11 = scalar_lea.hbm (!%p229_p9), %s1251_s5, %s748_s26 }
  0x13   : > { %v285_v0 = vld [vmem:[%s1247_s1 + $0x18] sm:$0xff]  ;;  %v980_v1 = vmov 0.0   ;;  %v284_v2 = vld [vmem:[%s1247_s1 + $0x10] sm:$0xff]  ;;  %vm981_vm0 = vmmov 0   ;;  %v283_v3 = vld [vmem:[%s1247_s1 + $0x8] sm:$0xff]  ;;  %s1082_s15 = scalar_select %p267_p10, %s1039_s25, 1 }
  0x14   : > { %792 = vmatprep.subr.mxu0 %v980_v1  ;;  %800 = vmatprep.mubr.msk.f32.mxu0 %vm981_vm0, %v980_v1  ;;  %v282_v4 = vld [vmem:[%s1247_s1] sm:$0xff]  ;;  %vm293_vm1 = vcmask 261120   ;;  %s982_s25 = smov [#allocation2]  }
  0x15   : > { %793 = vmatpush3.msra.mxu0 %v285_v0  ;;  %803 = vmatprep.subr.mxu1 %v980_v1  ;;  %s751_s18 = sshll.u32 %s1082_s15, 7  ;;  %v281_v5 = vld [vmem:[%s1246_s0] sm:$0xff]  ;;  %s727_s14 = sshll.u32 %s1082_s15, 3 }
  0x16   : > { %794 = vmatprep.subr.mxu0 %v980_v1  ;;  %835 = vmatprep.mubr.msk.f32.mxu1 %vm981_vm0, %v980_v1  ;;  %s1099_s29 = scalar_lea.vmem %s1249_s3, %s751_s18  ;;  %v728_v22 = vld [vmem:[%s1248_s2] ss:$0 sm:$0xff]  ;;  %s1162_s13 = scalar_lea.vmem %s1250_s4, %s751_s18 }
  0x17   : > { %795 = vmatpush3.msra.mxu0 %v284_v2  ;;  %v382_v6 = vld [vmem:[%s1099_s29 + $0x78] sm:$0xff]  ;;  %v381_v7 = vld [vmem:[%s1099_s29 + $0x70] sm:$0xff]  ;;  %v380_v8 = vld [vmem:[%s1099_s29 + $0x68] sm:$0xff]  ;;  %s280_s18 = scalar_lea.vmem %s1252_s6, %s727_s14  ;;  %s603_s15 = scalar_lea.sflag [#allocation3], %s258_s19 }
  0x18   : > { %796 = vmatprep.subr.mxu0 %v980_v1  ;;  %804 = vmatpush3.xpose.msk.msra.mxu1 %vm293_vm1, %v382_v6  ;;  %v379_v9 = vld [vmem:[%s1099_s29 + $0x60] sm:$0xff]  ;;  %v378_v10 = vld [vmem:[%s1099_s29 + $0x58] sm:$0xff]  ;;  %v377_v11 = vld [vmem:[%s1099_s29 + $0x50] sm:$0xff] }
  0x19   : > { %797 = vmatpush3.msra.mxu0 %v283_v3  ;;  %805 = vmatprep.subr.mxu1 %v980_v1  ;;  %v376_v12 = vld [vmem:[%s1099_s29 + $0x48] sm:$0xff]  ;;  %v375_v13 = vld [vmem:[%s1099_s29 + $0x40] sm:$0xff]  ;;  %v374_v14 = vld [vmem:[%s1099_s29 + $0x38] sm:$0xff] }
  0x1a   : > { %798 = vmatprep.subr.mxu0 %v980_v1  ;;  %v373_v15 = vld [vmem:[%s1099_s29 + $0x30] sm:$0xff]  ;;  %v372_v16 = vld [vmem:[%s1099_s29 + $0x28] sm:$0xff]  ;;  %v371_v17 = vld [vmem:[%s1099_s29 + $0x20] sm:$0xff] }
  0x1b   : > { %799 = vmatpush3.msra.mxu0 %v282_v4  ;;  %v370_v18 = vld [vmem:[%s1099_s29 + $0x18] sm:$0xff]  ;;  %v369_v19 = vld [vmem:[%s1099_s29 + $0x10] sm:$0xff]  ;;  %v368_v20 = vld [vmem:[%s1099_s29 + $0x8] sm:$0xff] }
  0x1c   : > { %801 = vmatmul.mubr.msk.f32.vlgmr.msra.gmra.mxu0 %vm293_vm1, %v281_v5  ;;  %838 = vmatprep.subr.mxu0 %v980_v1  ;;  %v367_v21 = vld [vmem:[%s1099_s29] sm:$0xff]  ;;  %v398_v29 = vld [vmem:[%s1162_s13 + $0x78] sm:$0xff]  ;;  %v397_v30 = vld [vmem:[%s1162_s13 + $0x70] sm:$0xff]  ;;  %s620_s29 = sshll.u32 %s260_s28, 4  ;;  %s1206_s29 = int_to_ptr.vmem [resolvable:$true] %s620_s29 }
  0x1d   : > { %870 = vmatprep.mubr.msk.f32.mxu0 %vm981_vm0, %v980_v1  ;;  %806 = vmatpush3.xpose.msk.msra.mxu1 %vm293_vm1, %v381_v7  ;;  %v396_v31 = vld [vmem:[%s1162_s13 + $0x68] sm:$0xff]  ;;  %v395_v32 = vld [vmem:[%s1162_s13 + $0x60] sm:$0xff]  ;;  %v394_v33 = vld [vmem:[%s1162_s13 + $0x58] sm:$0xff]  ;;  %s918_s12 = scalar_lea.vmem %s1206_s29, 128 }
  0x1e   : > { %807 = vmatprep.subr.mxu1 %v980_v1  ;;  %839 = vmatpush3.msra.mxu0 %v398_v29  ;;  %v393_v34 = vld [vmem:[%s1162_s13 + $0x50] sm:$0xff]  ;;  %v392_v35 = vld [vmem:[%s1162_s13 + $0x48] sm:$0xff]  ;;  %v391_v36 = vld [vmem:[%s1162_s13 + $0x40] sm:$0xff]  ;;  %p919_p11 = scmp.ne.s32.totalorder %s1206_s29, %s918_s12 }
  0x1f   : > { %840 = vmatprep.subr.mxu0 %v980_v1  ;;  %v390_v41 = vld [vmem:[%s1162_s13 + $0x38] sm:$0xff]  ;;  %v389_v42 = vld [vmem:[%s1162_s13 + $0x30] sm:$0xff]  ;;  %v388_v43 = vld [vmem:[%s1162_s13 + $0x28] sm:$0xff] }
  0x20   : > { %841 = vmatpush3.msra.mxu0 %v397_v30  ;;  %v387_v44 = vld [vmem:[%s1162_s13 + $0x20] sm:$0xff]  ;;  %v386_v45 = vld [vmem:[%s1162_s13 + $0x18] sm:$0xff]  ;;  %v385_v46 = vld [vmem:[%s1162_s13 + $0x10] sm:$0xff]  ;;  %p920_p12 = pnand %p919_p11, %p1056_p5 }
  0x21   : > { %808 = vmatpush3.xpose.msk.msra.mxu1 %vm293_vm1, %v380_v8  ;;  %842 = vmatprep.subr.mxu0 %v980_v1  ;;  %v384_v47 = vld [vmem:[%s1162_s13 + $0x8] sm:$0xff]  ;;  %v383_v48 = vld [vmem:[%s1162_s13] sm:$0xff]  ;;  %s922_s13 = sshll.u32 %s982_s25, 4  ;;  %s923_s13 = int_to_ptr.vmem [resolvable:$false] %s922_s13 }
  0x22   : > { %809 = vmatprep.subr.mxu1 %v980_v1  ;;  %843 = vmatpush3.msra.mxu0 %v396_v31  ;;  %p921_p13 = pneg %p920_p12  ;;  %s924_s14 = scalar_lea.vmem %s923_s13, 256 }
  0x23   : > { %844 = vmatprep.subr.mxu0 %v980_v1  ;;  %p925_p0 = scmp.lt.s32.totalorder %s1206_s29, %s923_s13  ;;  %p926_p1 = scmp.lt.s32.totalorder %s924_s14, %s918_s12 }
  0x24   : > { %845 = vmatpush3.msra.mxu0 %v395_v32 }
  0x25   : > { %810 = vmatpush3.xpose.msk.msra.mxu1 %vm293_vm1, %v379_v9  ;;  %846 = vmatprep.subr.mxu0 %v980_v1  ;;  %p927_p2 = por %p926_p1, %p925_p0 }
  0x26   : > { %811 = vmatprep.subr.mxu1 %v980_v1  ;;  %847 = vmatpush3.msra.mxu0 %v394_v33 }
  0x27   : > { %848 = vmatprep.subr.mxu0 %v980_v1  ;;  %p928_p3 = pnand %p927_p2, %p921_p13 }
  0x28   : > { %849 = vmatpush3.msra.mxu0 %v393_v34 }
  0x29   : > { %812 = vmatpush3.xpose.msk.msra.mxu1 %vm293_vm1, %v378_v10  ;;  %850 = vmatprep.subr.mxu0 %v980_v1 }
  0x2a   : > { %813 = vmatprep.subr.mxu1 %v980_v1  ;;  %851 = vmatpush3.msra.mxu0 %v392_v35 }
  0x2b   : > { %852 = vmatprep.subr.mxu0 %v980_v1 }
  0x2c   : > { %853 = vmatpush3.msra.mxu0 %v391_v36 }
  0x2d   : > { %814 = vmatpush3.xpose.msk.msra.mxu1 %vm293_vm1, %v377_v11  ;;  %854 = vmatprep.subr.mxu0 %v980_v1 }
  0x2e   : > { %815 = vmatprep.subr.mxu1 %v980_v1  ;;  %855 = vmatpush3.msra.mxu0 %v390_v41 }
  0x2f   : > { %856 = vmatprep.subr.mxu0 %v980_v1 }
  0x30   : > { %857 = vmatpush3.msra.mxu0 %v389_v42 }
  0x31   : > { %816 = vmatpush3.xpose.msk.msra.mxu1 %vm293_vm1, %v376_v12  ;;  %858 = vmatprep.subr.mxu0 %v980_v1 }
  0x32   : > { %817 = vmatprep.subr.mxu1 %v980_v1  ;;  %859 = vmatpush3.msra.mxu0 %v388_v43 }
  0x33   : > { %860 = vmatprep.subr.mxu0 %v980_v1 }
  0x34   : > { %861 = vmatpush3.msra.mxu0 %v387_v44 }
  0x35   : > { %818 = vmatpush3.xpose.msk.msra.mxu1 %vm293_vm1, %v375_v13  ;;  %862 = vmatprep.subr.mxu0 %v980_v1 }
  0x36   : > { %819 = vmatprep.subr.mxu1 %v980_v1  ;;  %863 = vmatpush3.msra.mxu0 %v386_v45 }
  0x37   : > { %864 = vmatprep.subr.mxu0 %v980_v1 }
  0x38   : > { %865 = vmatpush3.msra.mxu0 %v385_v46 }
  0x39   : > { %820 = vmatpush3.xpose.msk.msra.mxu1 %vm293_vm1, %v374_v14  ;;  %866 = vmatprep.subr.mxu0 %v980_v1 }
  0x3a   : > { %821 = vmatprep.subr.mxu1 %v980_v1  ;;  %867 = vmatpush3.msra.mxu0 %v384_v47 }
  0x3b   : > { %868 = vmatprep.subr.mxu0 %v980_v1 }
  0x3c   : > { %869 = vmatpush3.msra.mxu0 %v383_v48 }
  0x3d   : > { %822 = vmatpush3.xpose.msk.msra.mxu1 %vm293_vm1, %v373_v15 }
  0x3e   : > { %823 = vmatprep.subr.mxu1 %v980_v1 }
  0x41   : > { %824 = vmatpush3.xpose.msk.msra.mxu1 %vm293_vm1, %v372_v16 }
  0x42   : > { %825 = vmatprep.subr.mxu1 %v980_v1 }
  0x45   : > { %826 = vmatpush3.xpose.msk.msra.mxu1 %vm293_vm1, %v371_v17 }
  0x46   : > { %827 = vmatprep.subr.mxu1 %v980_v1 }
  0x49   : > { %828 = vmatpush3.xpose.msk.msra.mxu1 %vm293_vm1, %v370_v18 }
  0x4a   : > { %829 = vmatprep.subr.mxu1 %v980_v1 }
  0x4d   : > { %830 = vmatpush3.xpose.msk.msra.mxu1 %vm293_vm1, %v369_v19 }
  0x4e   : > { %831 = vmatprep.subr.mxu1 %v980_v1 }
  0x51   : > { %832 = vmatpush3.xpose.msk.msra.mxu1 %vm293_vm1, %v368_v20 }
  0x52   : > { %833 = vmatprep.subr.mxu1 %v980_v1 }
  0x55   : > { %834 = vmatpush3.xpose.msk.msra.mxu1 %vm293_vm1, %v367_v21 }
  0xdc   : > { %v363_v23 = vpop.f32.mrf.mxu0 }
  0xdd   : > { %v364_v24 = vadd.f32 %v728_v22, %v363_v23 }
  0xde   : > { %v802_v25 = vpop.f32.mrf.mxu0 }
  0xdf   : > { %836 = vmatmul.mubr.msk.f32.vlgmr.msra.gmra.mxu1 %vm293_vm1, %v364_v24 }
 0x19f   : > { %v516_v26 = vpop.f32.mrf.mxu1 }
 0x1a0   : > { %v520_v27 = vmul.f32 0.17677669, %v516_v26 }
 0x1a1   : > { %v837_v28 = vpop.f32.mrf.mxu1 }
 0x1a2   : > { %521 = vmax.xlane.f32.xlu0 %v520_v27 }
 0x22b   : > { %v522_v37 = vpop.xlane.xlu0 %521 }
 0x22c   : > { %v523_v38 = vsub.f32 %v520_v27, %v522_v37 }
 0x22e   : > { %v524_v39 = vmul.f32 1.442695, %v523_v38 }
 0x230   : > { %914 = vpow2.f32 %v524_v39 }
 0x23d   : > { %v915_v40 = vpop.eup %914 }
 0x23e   : > { %526 = vadd.xlane.f32.xlu0 %v915_v40 }
 0x2c7   : > { %v527_v49 = vpop.xlane.xlu0 %526 }
 0x2c8   : > { %916 = vrcp.f32 %v527_v49 }
 0x2d5   : > { %v917_v50 = vpop.eup %916 }
 0x2d6   : > { %v529_v51 = vmul.f32 %v917_v50, %v915_v40 }
 0x2d8   : > { %871 = vmatmul.mubr.f32.vlgmr.msra.gmra.mxu0 %v529_v51  ;;  %601 = vst [vmem:[%s280_s18] sm:$0xff] %v529_v51 }
 0x398   : > { %v596_v52 = vpop.f32.mrf.mxu0 }
 0x399   : > { %600 = vst.msk [vmem:[%s260_s28] sm:$0xff] %vm293_vm1, %v596_v52 }
 0x39a   : > { %v872_v53 = vpop.f32.mrf.mxu0 }
 0x39b   : > { %931 = shalt.err (!%p928_p3)
}
 0x39c   : > { %s932_s16 = scalar_lea.hbm %s1204_s11, 128  ;;  %s936_s19 = scalar_lea.hbm %s1251_s5, 256 }
 0x39d   : > { %p933_p4 = scmp.ne.s32.totalorder %s1204_s11, %s932_s16  ;;  %p937_p9 = scmp.lt.s32.totalorder %s1204_s11, %s1251_s5 }
 0x39e   : > { %p938_p10 = scmp.lt.s32.totalorder %s936_s19, %s932_s16 }
 0x39f   : > { %p934_p7 = pnand %p933_p4, %p1056_p5 }
 0x3a0   : > { %p939_p11 = por %p938_p10, %p937_p9 }
 0x3a1   : > { %p935_p8 = pneg %p934_p7 }
 0x3a3   : > { %p940_p12 = pnand %p939_p11, %p935_p8 }
 0x3a5   : > { %943 = shalt.err (!%p940_p12)
}
 0x3a6   : > { %873 = dma.vmem_to_hbm [thread:$0]  (%p1056_p5), %s1206_s29, 128, %s1204_s11, %s603_s15  }
 0x3a7 PF: > { %p879_p13 = scmp.ge.s32.totalorder %s978_s24, 2  ;;  %s635_s28 = sand.u32 1, %s966_s21  }
 0x3a8   : > { %s636_s9 = scalar_lea.sflag [#allocation3], %s635_s28 }
 0x3a9   : > { %p876_p0 = pnand %p879_p13, %p1060_p6 }
 0x3ab   : > { %p877_p1 = pneg %p876_p0 }
 0x3ad   : > { %961 = dma.done.wait (%p877_p1), %s636_s9, 128  }
 0x3ae   : > { %963 = vsyncadd (%p877_p1), %s636_s9, 4294967168  ;;  %p17_p2 = scmp.ge.s32.totalorder %s1043_s27, 4   ;;  %s1255_s21 = smov %s970_s22 }
 0x3af   : > { %s1256_s22 = smov %s974_s23  ;;  %s1257_s23 = smov %s1054_s30 }
 0x3b0   : > { %s1258_s24 = smov %s1043_s27  ;;  %19 = sbr.rel (!%p17_p2) target bundleno = 3 (0x3), region = 90 }
 0x3b5   :  { %648 = vsyncpa [#allocation3], 1 }
 0x3b6   :  { %650 = vsyncpa [#allocation3 + $0x1], 1 }

</bundles_post_ra>
